<compile_context>
chip_gen: v5e
topology: v5e:2x2
jax: 0.10.0
libtpu: 0.0.40
codegen_flags: <defaults>
</compile_context>

<pallas_src>
import functools

import jax
import jax.numpy as jnp
from jax.experimental import pallas as pl
from jax.experimental.pallas import tpu as pltpu


def vae_kernel(x_ref,
               w1_ref, b1_ref,
               w23_ref, b23_ref,
               w4_ref, b4_ref,
               o_ref):
    # line1 + ReLU  (bf16 MXU inputs, f32 accumulate, f32 elementwise)
    z = jnp.dot(x_ref[...].astype(jnp.bfloat16), w1_ref[...],
                preferred_element_type=jnp.float32)
    z = jnp.maximum(z + b1_ref[...], 0.0)

    # fused line2+line3 + ReLU
    # (z@w2 + b2)@w3 + b3 == z@(w2@w3) + (b2@w3 + b3); W23/B23 precomputed f32.
    z = jnp.dot(z.astype(jnp.bfloat16), w23_ref[...],
                preferred_element_type=jnp.float32)
    z = jnp.maximum(z + b23_ref[...], 0.0)

    # line4 + sigmoid  (exp and approx reciprocal both issue on the EUP slot)
    z = jnp.dot(z.astype(jnp.bfloat16), w4_ref[...],
                preferred_element_type=jnp.float32)
    z = z + b4_ref[...]
    o_ref[...] = pl.reciprocal(1.0 + jnp.exp(-z), approx=True).astype(o_ref.dtype)


def prepare_kernel_params(params):
    """Fold layer2/layer3 into one f32-precomputed matmul and cast weights to
    bf16.  Weight layout is [in, out] (transposed vs nn.Linear's [out, in])."""
    w1, b1, w2, b2, w3, b3, w4, b4 = params
    w23 = w2 @ w3                 # [d1, d1] f32 (exact fusion: no latent act.)
    b23 = b2 @ w3 + b3            # [1, d1]  f32
    return [w1.astype(jnp.bfloat16), b1,
            w23.astype(jnp.bfloat16), b23,
            w4.astype(jnp.bfloat16), b4]


def choose_tile(batch, *, max_tile=512):
    """Batch tile: round the batch up to a multiple of 128 (MXU-height /
    sublane friendly) and cap at max_tile.  Tiny batches collapse to a single
    grid step; batches > max_tile get >=2 steps so the 'parallel' axis can
    feed both v7x TensorCores.  Keep max_tile <= 2048 unless vmem_limit_bytes
    is raised (v7x default scoped-VMEM limit)."""
    bp = pl.cdiv(batch, 128) * 128
    return int(min(bp, max_tile))


@functools.partial(jax.jit, static_argnames=("tm",))
def vae_forward(x, kparams, *, tm):
    """x: [B, D0] (f32 or bf16); kparams: output of prepare_kernel_params.
    Returns bf16 [B, D0]."""
    B, D0 = x.shape
    D1 = kparams[0].shape[1]

    # Pad the batch up to a multiple of the batch tile.
    Bp = pl.cdiv(B, tm) * tm
    if Bp != B:
        x = jnp.pad(x, ((0, Bp - B), (0, 0)))
    grid = (Bp // tm,)

    # Weights / biases: full-array VMEM blocks, constant index_map -> DMA'd
    # once, resident across all grid steps (~0.3 MiB total).
    param_specs = [pl.BlockSpec(p.shape, lambda i: (0, 0)) for p in kparams]

    param_bytes = sum(p.size * p.dtype.itemsize for p in kparams)
    cost = pl.CostEstimate(
        flops=2 * Bp * (D0 * D1 + D1 * D1 + D1 * D0),   # 3 fused matmuls
        transcendentals=Bp * D0,                        # sigmoid exp (+ vrcp)
        bytes_accessed=(Bp * D0 * x.dtype.itemsize      # x
                        + param_bytes                   # resident weights
                        + Bp * D0 * 2),                 # bf16 out
    )

    out = pl.pallas_call(
        vae_kernel,
        out_shape=jax.ShapeDtypeStruct((Bp, D0), jnp.bfloat16),
        grid=grid,
        in_specs=[pl.BlockSpec((tm, D0), lambda i: (i, 0))] + param_specs,
        out_specs=pl.BlockSpec((tm, D0), lambda i: (i, 0)),
        compiler_params=pltpu.CompilerParams(
            dimension_semantics=("parallel",)),
        cost_estimate=cost,
    )(x, *kparams)

    if Bp != B:
        out = out[:B]
    return out


def init_linear_params(key, in_features, out_features):
    """Deterministic init mimicking torch.nn.Linear (uniform +/- 1/sqrt(fan_in)).
    Weight is stored [in, out] (transposed vs PyTorch's [out, in])."""
    kw, kb = jax.random.split(key)
    bound = 1.0 / jnp.sqrt(jnp.float32(in_features))
    w = jax.random.uniform(kw, (in_features, out_features), jnp.float32,
                           minval=-bound, maxval=bound)
    b = jax.random.uniform(kb, (1, out_features), jnp.float32,
                           minval=-bound, maxval=bound)
    return w, b


def make_vae_params(key, shapes):
    d0, d1, d2 = shapes
    dims = [(d0, d1), (d1, d2), (d2, d1), (d1, d0)]
    keys = jax.random.split(key, len(dims))
    params = []
    for k, (din, dout) in zip(keys, dims):
        w, b = init_linear_params(k, din, dout)
        params.extend([w, b])
    return params


def vae_reference(x, params):
    """Pure-JAX f32 reference of the PyTorch forward, for the sanity check."""
    w1, b1, w2, b2, w3, b3, w4, b4 = params
    z = jax.nn.relu(x @ w1 + b1)
    z = z @ w2 + b2
    z = jax.nn.relu(z @ w3 + b3)
    return jax.nn.sigmoid(z @ w4 + b4)


if __name__ == "__main__":
    shapes = (256, 128, 64)   # (in_features, hidden1, hidden2/latent)
    batch = 200               # not a multiple of 128 -> exercises padding

    key = jax.random.PRNGKey(0)
    k_x, k_p = jax.random.split(key)
    x = jax.random.normal(k_x, (batch, shapes[0]), jnp.float32)

    params = make_vae_params(k_p, shapes)          # f32, for the reference
    kparams = prepare_kernel_params(params)        # bf16 weights, fused 2+3

    tm = choose_tile(batch)                        # -> 256 here (1 grid step)
    out = vae_forward(x, kparams, tm=tm)
    out = jax.block_until_ready(out)

    ref = vae_reference(x, params)
    assert out.shape == (batch, shapes[0])
    assert out.dtype == jnp.bfloat16
    out_f32 = out.astype(jnp.float32)
    # bf16 MXU inputs + bf16 output -> loosened tolerance vs the f32 reference.
    max_err = float(jnp.max(jnp.abs(out_f32 - ref)))
    assert jnp.allclose(out_f32, ref, atol=3e-2, rtol=3e-2), max_err

    print("KERNEL_OK")
</pallas_src>

<mosaic_0001>
module attributes {stable_mosaic.version = 11 : i64} {
  func.func @vae_kernel(%arg0: i32, %arg1: memref<256x256xf32, #tpu.memory_space<vmem>>, %arg2: memref<256x128xbf16, #tpu.memory_space<vmem>>, %arg3: memref<1x128xf32, #tpu.memory_space<vmem>>, %arg4: memref<128x128xbf16, #tpu.memory_space<vmem>>, %arg5: memref<1x128xf32, #tpu.memory_space<vmem>>, %arg6: memref<128x256xbf16, #tpu.memory_space<vmem>>, %arg7: memref<1x256xf32, #tpu.memory_space<vmem>>, %arg8: memref<256x256xbf16, #tpu.memory_space<vmem>>) attributes {dimension_semantics = [#tpu.dimension_semantics<parallel>], iteration_bounds = array<i64: 1>, scalar_prefetch = 0 : i64, scratch_operands = 0 : i64, tpu.core_type = #tpu.core_type<tc>, window_params = [{transform_indices = @transform_0, window_bounds = array<i64: 256, 256>}, {pipeline_mode = #tpu.pipeline_mode<synchronous>, transform_indices = @transform_1, window_bounds = array<i64: 256, 128>}, {pipeline_mode = #tpu.pipeline_mode<synchronous>, transform_indices = @transform_2, window_bounds = array<i64: 1, 128>}, {pipeline_mode = #tpu.pipeline_mode<synchronous>, transform_indices = @transform_3, window_bounds = array<i64: 128, 128>}, {pipeline_mode = #tpu.pipeline_mode<synchronous>, transform_indices = @transform_4, window_bounds = array<i64: 1, 128>}, {pipeline_mode = #tpu.pipeline_mode<synchronous>, transform_indices = @transform_5, window_bounds = array<i64: 128, 256>}, {pipeline_mode = #tpu.pipeline_mode<synchronous>, transform_indices = @transform_6, window_bounds = array<i64: 1, 256>}, {transform_indices = @transform_7, window_bounds = array<i64: 256, 256>}]} {
    %c0 = arith.constant 0 : index
    %c0_0 = arith.constant 0 : index
    %0 = vector.load %arg1[%c0, %c0_0] : memref<256x256xf32, #tpu.memory_space<vmem>>, vector<256x256xf32>
    %1 = arith.truncf %0 : vector<256x256xf32> to vector<256x256xbf16>
    %c0_1 = arith.constant 0 : index
    %c0_2 = arith.constant 0 : index
    %2 = vector.load %arg2[%c0_1, %c0_2] : memref<256x128xbf16, #tpu.memory_space<vmem>>, vector<256x128xbf16>
    %cst = arith.constant dense<0.000000e+00> : vector<256x128xf32>
    %3 = tpu.matmul %1, %2, %cst {dimension_numbers = #tpu.dot_dimension_numbers<[1], [0], [0], [1], [0, 0, 1, 1], [], []>} : vector<256x256xbf16>, vector<256x128xbf16>, vector<256x128xf32> -> vector<256x128xf32>
    %c0_3 = arith.constant 0 : index
    %c0_4 = arith.constant 0 : index
    %4 = vector.load %arg3[%c0_3, %c0_4] : memref<1x128xf32, #tpu.memory_space<vmem>>, vector<1x128xf32>
    %5 = vector.broadcast %4 : vector<1x128xf32> to vector<256x128xf32>
    %6 = arith.addf %3, %5 : vector<256x128xf32>
    %cst_5 = arith.constant 0.000000e+00 : f32
    %7 = vector.broadcast %cst_5 : f32 to vector<256x128xf32>
    %8 = arith.maximumf %6, %7 : vector<256x128xf32>
    %9 = arith.truncf %8 : vector<256x128xf32> to vector<256x128xbf16>
    %c0_6 = arith.constant 0 : index
    %c0_7 = arith.constant 0 : index
    %10 = vector.load %arg4[%c0_6, %c0_7] : memref<128x128xbf16, #tpu.memory_space<vmem>>, vector<128x128xbf16>
    %cst_8 = arith.constant dense<0.000000e+00> : vector<256x128xf32>
    %11 = tpu.matmul %9, %10, %cst_8 {dimension_numbers = #tpu.dot_dimension_numbers<[1], [0], [0], [1], [0, 0, 1, 1], [], []>} : vector<256x128xbf16>, vector<128x128xbf16>, vector<256x128xf32> -> vector<256x128xf32>
    %c0_9 = arith.constant 0 : index
    %c0_10 = arith.constant 0 : index
    %12 = vector.load %arg5[%c0_9, %c0_10] : memref<1x128xf32, #tpu.memory_space<vmem>>, vector<1x128xf32>
    %13 = vector.broadcast %12 : vector<1x128xf32> to vector<256x128xf32>
    %14 = arith.addf %11, %13 : vector<256x128xf32>
    %cst_11 = arith.constant 0.000000e+00 : f32
    %15 = vector.broadcast %cst_11 : f32 to vector<256x128xf32>
    %16 = arith.maximumf %14, %15 : vector<256x128xf32>
    %17 = arith.truncf %16 : vector<256x128xf32> to vector<256x128xbf16>
    %c0_12 = arith.constant 0 : index
    %c0_13 = arith.constant 0 : index
    %18 = vector.load %arg6[%c0_12, %c0_13] : memref<128x256xbf16, #tpu.memory_space<vmem>>, vector<128x256xbf16>
    %cst_14 = arith.constant dense<0.000000e+00> : vector<256x256xf32>
    %19 = tpu.matmul %17, %18, %cst_14 {dimension_numbers = #tpu.dot_dimension_numbers<[1], [0], [0], [1], [0, 0, 1, 1], [], []>} : vector<256x128xbf16>, vector<128x256xbf16>, vector<256x256xf32> -> vector<256x256xf32>
    %c0_15 = arith.constant 0 : index
    %c0_16 = arith.constant 0 : index
    %20 = vector.load %arg7[%c0_15, %c0_16] : memref<1x256xf32, #tpu.memory_space<vmem>>, vector<1x256xf32>
    %21 = vector.broadcast %20 : vector<1x256xf32> to vector<256x256xf32>
    %22 = arith.addf %19, %21 : vector<256x256xf32>
    %cst_17 = arith.constant 0.000000e+00 : f32
    %23 = vector.broadcast %cst_17 : f32 to vector<256x256xf32>
    %24 = arith.subf %23, %22 : vector<256x256xf32>
    %25 = math.exp %24 : vector<256x256xf32>
    %cst_18 = arith.constant 1.000000e+00 : f32
    %26 = vector.broadcast %cst_18 : f32 to vector<256x256xf32>
    %27 = arith.addf %26, %25 : vector<256x256xf32>
    %28 = tpu.reciprocal %27 {approx = true} : vector<256x256xf32> -> vector<256x256xf32>
    %29 = arith.truncf %28 : vector<256x256xf32> to vector<256x256xbf16>
    %c0_19 = arith.constant 0 : index
    %c0_20 = arith.constant 0 : index
    %30 = vector.load %arg8[%c0_19, %c0_20] : memref<256x256xbf16, #tpu.memory_space<vmem>>, vector<256x256xbf16>
    tpu.vector_store %arg8[%c0_19, %c0_20], %29 {strides = array<i32>} : memref<256x256xbf16, #tpu.memory_space<vmem>>, vector<256x256xbf16>,
    return
  }
  func.func @transform_0(%arg0: i32) -> (i32, i32) {
    %c0_i32 = arith.constant 0 : i32
    %c0_i32_0 = arith.constant 0 : i32
    return %arg0, %c0_i32 : i32, i32
  }
  func.func @transform_1(%arg0: i32) -> (i32, i32) {
    %c0_i32 = arith.constant 0 : i32
    %c0_i32_0 = arith.constant 0 : i32
    %c0_i32_1 = arith.constant 0 : i32
    return %c0_i32, %c0_i32_0 : i32, i32
  }
  func.func @transform_2(%arg0: i32) -> (i32, i32) {
    %c0_i32 = arith.constant 0 : i32
    %c0_i32_0 = arith.constant 0 : i32
    %c0_i32_1 = arith.constant 0 : i32
    return %c0_i32, %c0_i32_0 : i32, i32
  }
  func.func @transform_3(%arg0: i32) -> (i32, i32) {
    %c0_i32 = arith.constant 0 : i32
    %c0_i32_0 = arith.constant 0 : i32
    %c0_i32_1 = arith.constant 0 : i32
    return %c0_i32, %c0_i32_0 : i32, i32
  }
  func.func @transform_4(%arg0: i32) -> (i32, i32) {
    %c0_i32 = arith.constant 0 : i32
    %c0_i32_0 = arith.constant 0 : i32
    %c0_i32_1 = arith.constant 0 : i32
    return %c0_i32, %c0_i32_0 : i32, i32
  }
  func.func @transform_5(%arg0: i32) -> (i32, i32) {
    %c0_i32 = arith.constant 0 : i32
    %c0_i32_0 = arith.constant 0 : i32
    %c0_i32_1 = arith.constant 0 : i32
    return %c0_i32, %c0_i32_0 : i32, i32
  }
  func.func @transform_6(%arg0: i32) -> (i32, i32) {
    %c0_i32 = arith.constant 0 : i32
    %c0_i32_0 = arith.constant 0 : i32
    %c0_i32_1 = arith.constant 0 : i32
    return %c0_i32, %c0_i32_0 : i32, i32
  }
  func.func @transform_7(%arg0: i32) -> (i32, i32) {
    %c0_i32 = arith.constant 0 : i32
    %c0_i32_0 = arith.constant 0 : i32
    return %arg0, %c0_i32 : i32, i32
  }
}

</mosaic_0001>

<bundles_post_ra>
// kernel: vae_forward.1
= control target key start
LH: loop header
LB: loop body
LE: loop exit
PB: predicated region body
PF: predicated region fallthrough
CT: control target
= control target key end

     0   :  { %s2515_s1 = inlined_call_operand.vmem [shape: bf16[256,128], index: 1, kind: input, shape index: {}]   ;;  %s2516_s2 = inlined_call_operand.vmem [shape: f32[1,128], index: 2, kind: input, shape index: {}]   ;;  %s2517_s0 = inlined_call_operand.vmem [shape: f32[256,256], index: 0, kind: input, shape index: {}]   ;;  %s2518_s3 = inlined_call_operand.vmem [shape: bf16[128,128], index: 3, kind: input, shape index: {}]   ;;  %s2519_s4 = inlined_call_operand.vmem [shape: f32[1,128], index: 4, kind: input, shape index: {}]   ;;  %s2520_s5 = inlined_call_operand.vmem [shape: bf16[128,256], index: 5, kind: input, shape index: {}]   ;;  %s2521_s6 = inlined_call_operand.vmem [shape: f32[1,256], index: 6, kind: input, shape index: {}]   ;;  %s2522_s7 = inlined_call_operand.vmem [shape: bf16[256,256], index: 7, kind: output, shape index: {}]  }
   0x1   :  { %v1520_v0 = vld [vmem:[%s2515_s1 + $0x38] sm:$0xff]  ;;  %v1519_v1 = vld [vmem:[%s2515_s1 + $0x30] sm:$0xff]  ;;  %v1518_v2 = vld [vmem:[%s2515_s1 + $0x28] sm:$0xff] }
   0x2   :  { %1553 = vmatpush.bf16.msra.mxu1 %v1520_v0  ;;  %254 = vmatpush.bf16.msra.mxu0 %v1520_v0  ;;  %v1517_v3 = vld [vmem:[%s2515_s1 + $0x20] sm:$0xff]  ;;  %v1516_v4 = vld [vmem:[%s2515_s1 + $0x18] sm:$0xff]  ;;  %v1515_v5 = vld [vmem:[%s2515_s1 + $0x10] sm:$0xff] }
   0x3   :  { %1554 = vmatpush.bf16.msra.mxu2 %v1520_v0  ;;  %1555 = vmatpush.bf16.msra.mxu3 %v1520_v0  ;;  %v1514_v6 = vld [vmem:[%s2515_s1 + $0x8] sm:$0xff]  ;;  %v1513_v7 = vld [vmem:[%s2515_s1] sm:$0xff]  ;;  %v44_v9 = vld [vmem:[%s2517_s0 + $0x90] sm:$0xff] }
   0x4   :  { %v42_v8 = vld [vmem:[%s2517_s0 + $0x80] sm:$0xff]  ;;  %v1528_v10 = vld [vmem:[%s2515_s1 + $0x78] sm:$0xff]  ;;  %v1527_v12 = vld [vmem:[%s2515_s1 + $0x70] sm:$0xff] }
   0x5   :  { %v98_v11 = vpack.c.bf16 %v44_v9, %v42_v8  ;;  %v1526_v13 = vld [vmem:[%s2515_s1 + $0x68] sm:$0xff]  ;;  %v1525_v14 = vld [vmem:[%s2515_s1 + $0x60] sm:$0xff]  ;;  %v48_v16 = vld [vmem:[%s2517_s0 + $0xb0] sm:$0xff] }
   0x6   :  { %1556 = vmatpush.bf16.msra.mxu1 %v1519_v1  ;;  %255 = vmatpush.bf16.msra.mxu0 %v1519_v1  ;;  %v46_v15 = vld [vmem:[%s2517_s0 + $0xa0] sm:$0xff]  ;;  %v1524_v17 = vld [vmem:[%s2515_s1 + $0x58] sm:$0xff]  ;;  %v1523_v19 = vld [vmem:[%s2515_s1 + $0x50] sm:$0xff] }
   0x7   :  { %1557 = vmatpush.bf16.msra.mxu2 %v1519_v1  ;;  %1558 = vmatpush.bf16.msra.mxu3 %v1519_v1  ;;  %v100_v18 = vpack.c.bf16 %v48_v16, %v46_v15  ;;  %v26_v20 = vld [vmem:[%s2517_s0] sm:$0xff]  ;;  %v28_v21 = vld [vmem:[%s2517_s0 + $0x10] sm:$0xff]  ;;  %v1522_v23 = vld [vmem:[%s2515_s1 + $0x48] sm:$0xff] }
   0x8   :  { %v90_v22 = vpack.c.bf16 %v28_v21, %v26_v20  ;;  %v1521_v24 = vld [vmem:[%s2515_s1 + $0x40] sm:$0xff]  ;;  %v52_v26 = vld [vmem:[%s2517_s0 + $0xd0] sm:$0xff]  ;;  %v27_v37 = vld [vmem:[%s2517_s0 + $0x8] sm:$0xff] }
   0x9   :  { %v50_v25 = vld [vmem:[%s2517_s0 + $0xc0] sm:$0xff]  ;;  %v32_v29 = vld [vmem:[%s2517_s0 + $0x30] sm:$0xff]  ;;  %v29_v38 = vld [vmem:[%s2517_s0 + $0x18] sm:$0xff] }
   0xa   :  { %1559 = vmatpush.bf16.msra.mxu1 %v1518_v2  ;;  %256 = vmatpush.bf16.msra.mxu0 %v1518_v2  ;;  %v102_v27 = vpack.c.bf16 %v52_v26, %v50_v25  ;;  %v30_v28 = vld [vmem:[%s2517_s0 + $0x20] sm:$0xff]  ;;  %v56_v32 = vld [vmem:[%s2517_s0 + $0xf0] sm:$0xff]  ;;  %v91_v39 = vpack.c.bf16 %v29_v38, %v27_v37  ;;  %v31_v43 = vld [vmem:[%s2517_s0 + $0x28] sm:$0xff] }
   0xb   :  { %1560 = vmatpush.bf16.msra.mxu2 %v1518_v2  ;;  %1561 = vmatpush.bf16.msra.mxu3 %v1518_v2  ;;  %v92_v30 = vpack.c.bf16 %v32_v29, %v30_v28  ;;  %v54_v31 = vld [vmem:[%s2517_s0 + $0xe0] sm:$0xff]  ;;  %v36_v35 = vld [vmem:[%s2517_s0 + $0x50] sm:$0xff]  ;;  %v33_v44 = vld [vmem:[%s2517_s0 + $0x38] sm:$0xff] }
   0xc   :  { %v104_v33 = vpack.c.bf16 %v56_v32, %v54_v31  ;;  %v34_v34 = vld [vmem:[%s2517_s0 + $0x40] sm:$0xff]  ;;  %v40_v41 = vld [vmem:[%s2517_s0 + $0x70] sm:$0xff]  ;;  %v93_v45 = vpack.c.bf16 %v33_v44, %v31_v43  ;;  %v35_v46 = vld [vmem:[%s2517_s0 + $0x48] sm:$0xff] }
   0xd   :  { %v94_v36 = vpack.c.bf16 %v36_v35, %v34_v34  ;;  %v38_v40 = vld [vmem:[%s2517_s0 + $0x60] sm:$0xff]  ;;  %v37_v47 = vld [vmem:[%s2517_s0 + $0x58] sm:$0xff]  ;;  %v60_v50 = vld [vmem:[%s2517_s0 + $0x110] sm:$0xff] }
   0xe   :  { %1562 = vmatpush.bf16.msra.mxu1 %v1517_v3  ;;  %257 = vmatpush.bf16.msra.mxu0 %v1517_v3  ;;  %v96_v42 = vpack.c.bf16 %v40_v41, %v38_v40  ;;  %v95_v48 = vpack.c.bf16 %v37_v47, %v35_v46  ;;  %v58_v49 = vld [vmem:[%s2517_s0 + $0x100] sm:$0xff]  ;;  %v1536_v52 = vld [vmem:[%s2518_s3 + $0x38] sm:$0xff]  ;;  %v39_v53 = vld [vmem:[%s2517_s0 + $0x68] sm:$0xff] }
   0xf   :  { %1563 = vmatpush.bf16.msra.mxu2 %v1517_v3  ;;  %1564 = vmatpush.bf16.msra.mxu3 %v1517_v3  ;;  %v106_v51 = vpack.c.bf16 %v60_v50, %v58_v49  ;;  %v41_v54 = vld [vmem:[%s2517_s0 + $0x78] sm:$0xff]  ;;  %v62_v56 = vld [vmem:[%s2517_s0 + $0x120] sm:$0xff]  ;;  %v64_v57 = vld [vmem:[%s2517_s0 + $0x130] sm:$0xff] }
  0x10   :  { %v97_v55 = vpack.c.bf16 %v41_v54, %v39_v53  ;;  %v1535_v58 = vld [vmem:[%s2518_s3 + $0x30] sm:$0xff]  ;;  %v108_v59 = vpack.c.bf16 %v64_v57, %v62_v56  ;;  %v1534_v60 = vld [vmem:[%s2518_s3 + $0x28] sm:$0xff]  ;;  %v45_v62 = vld [vmem:[%s2517_s0 + $0x98] sm:$0xff] }
  0x11   :  { %v43_v61 = vld [vmem:[%s2517_s0 + $0x88] sm:$0xff]  ;;  %v66_v1 = vld [vmem:[%s2517_s0 + $0x140] sm:$0xff]  ;;  %v68_v2 = vld [vmem:[%s2517_s0 + $0x150] sm:$0xff] }
  0x12   :  { %1565 = vmatpush.bf16.msra.mxu1 %v1516_v4  ;;  %258 = vmatpush.bf16.msra.mxu0 %v1516_v4  ;;  %v99_v63 = vpack.c.bf16 %v45_v62, %v43_v61  ;;  %v1533_v3 = vld [vmem:[%s2518_s3 + $0x20] sm:$0xff]  ;;  %v49_v8 = vld [vmem:[%s2517_s0 + $0xb8] sm:$0xff]  ;;  %v1530_v16 = vld [vmem:[%s2518_s3 + $0x8] sm:$0xff] }
  0x13   :  { %1566 = vmatpush.bf16.msra.mxu2 %v1516_v4  ;;  %1567 = vmatpush.bf16.msra.mxu3 %v1516_v4  ;;  %v110_v4 = vpack.c.bf16 %v68_v2, %v66_v1  ;;  %v1529_v21 = vld [vmem:[%s2518_s3] sm:$0xff]  ;;  %v61_v31 = vld [vmem:[%s2517_s0 + $0x118] sm:$0xff]  ;;  %v63_v44 = vld [vmem:[%s2517_s0 + $0x128] sm:$0xff] }
  0x14   :  { %v2092_v34 = vld [vmem:[%s2516_s2] ss:$0 sm:$0xff]  ;;  %v76_v50 = vld [vmem:[%s2517_s0 + $0x190] sm:$0xff]  ;;  %v69_v61 = vld [vmem:[%s2517_s0 + $0x158] sm:$0xff] }
  0x15   :  { %v74_v49 = vld [vmem:[%s2517_s0 + $0x180] sm:$0xff] }
  0x16   :  { %1568 = vmatpush.bf16.msra.mxu1 %v1515_v5  ;;  %259 = vmatpush.bf16.msra.mxu0 %v1515_v5 }
  0x17   :  { %1569 = vmatpush.bf16.msra.mxu2 %v1515_v5  ;;  %1570 = vmatpush.bf16.msra.mxu3 %v1515_v5 }
  0x1a   :  { %1571 = vmatpush.bf16.msra.mxu1 %v1514_v6  ;;  %260 = vmatpush.bf16.msra.mxu0 %v1514_v6 }
  0x1b   :  { %1572 = vmatpush.bf16.msra.mxu2 %v1514_v6  ;;  %1573 = vmatpush.bf16.msra.mxu3 %v1514_v6  ;;  %v1532_v6 = vld [vmem:[%s2518_s3 + $0x18] sm:$0xff] }
  0x1e   :  { %1574 = vmatpush.bf16.msra.mxu1 %v1513_v7  ;;  %261 = vmatpush.bf16.msra.mxu0 %v1513_v7 }
  0x1f   :  { %1575 = vmatpush.bf16.msra.mxu2 %v1513_v7  ;;  %1576 = vmatpush.bf16.msra.mxu3 %v1513_v7  ;;  %v47_v7 = vld [vmem:[%s2517_s0 + $0xa8] sm:$0xff] }
  0x20   :  { %v101_v9 = vpack.c.bf16 %v49_v8, %v47_v7 }
  0x21   :  { %282 = vmatmul.bf16.vlgmr.msra.gmra.mxu1 %v98_v11  ;;  %262 = vmatmul.bf16.vlgmr.msra.gmra.mxu0 %v90_v22  ;;  %v70_v11 = vld [vmem:[%s2517_s0 + $0x160] sm:$0xff] }
  0x22   :  { %343 = vmatpush.bf16.msrb.mxu1 %v1528_v10  ;;  %302 = vmatmul.bf16.vlgmr.msra.gmra.mxu2 %v106_v51  ;;  %v114_v51 = vpack.c.bf16 %v76_v50, %v74_v49  ;;  %v1551_v50 = vld [vmem:[%s2520_s5 + $0x74] sm:$0xf] }
  0x23   :  { %548 = vmatpush.bf16.msrb.mxu2 %v1536_v52 }
  0x24   :  { %322 = vmatmul.bf16.vlgmr.msra.gmra.mxu3 %v114_v51  ;;  %v1509_v51 = vld [vmem:[%s2520_s5 + $0x78] sm:$0xf0] }
  0x26   :  { %344 = vmatpush.bf16.msrb.mxu1 %v1527_v12  ;;  %v72_v12 = vld [vmem:[%s2517_s0 + $0x170] sm:$0xff] }
  0x27   :  { %549 = vmatpush.bf16.msrb.mxu2 %v1535_v58 }
  0x2a   :  { %345 = vmatpush.bf16.msrb.mxu1 %v1526_v13  ;;  %v1531_v13 = vld [vmem:[%s2518_s3 + $0x10] sm:$0xff] }
  0x2b   :  { %550 = vmatpush.bf16.msrb.mxu2 %v1534_v60  ;;  %v67_v60 = vld [vmem:[%s2517_s0 + $0x148] sm:$0xff] }
  0x2e   :  { %346 = vmatpush.bf16.msrb.mxu1 %v1525_v14  ;;  %v112_v14 = vpack.c.bf16 %v72_v12, %v70_v11 }
  0x2f   :  { %551 = vmatpush.bf16.msrb.mxu2 %v1533_v3  ;;  %v78_v3 = vld [vmem:[%s2517_s0 + $0x1a0] sm:$0xff] }
  0x31   :  { %287 = vmatmul.bf16.gmra.mxu1 %v100_v18  ;;  %267 = vmatmul.bf16.gmra.mxu0 %v92_v30  ;;  %v53_v18 = vld [vmem:[%s2517_s0 + $0xd8] sm:$0xff]  ;;  %v59_v30 = vld [vmem:[%s2517_s0 + $0x108] sm:$0xff] }
  0x32   :  { %347 = vmatpush.bf16.msrb.mxu1 %v1524_v17  ;;  %307 = vmatmul.bf16.gmra.mxu2 %v108_v59  ;;  %v51_v17 = vld [vmem:[%s2517_s0 + $0xc8] sm:$0xff]  ;;  %v107_v32 = vpack.c.bf16 %v61_v31, %v59_v30 }
  0x33   :  { %552 = vmatpush.bf16.msrb.mxu2 %v1532_v6 }
  0x36   :  { %348 = vmatpush.bf16.msrb.mxu1 %v1523_v19  ;;  %v103_v19 = vpack.c.bf16 %v53_v18, %v51_v17  ;;  %v71_v17 = vld [vmem:[%s2517_s0 + $0x168] sm:$0xff]  ;;  %v73_v18 = vld [vmem:[%s2517_s0 + $0x178] sm:$0xff] }
  0x37   :  { %553 = vmatpush.bf16.msrb.mxu2 %v1531_v13 }
  0x3a   :  { %349 = vmatpush.bf16.msrb.mxu1 %v1522_v23  ;;  %v55_v23 = vld [vmem:[%s2517_s0 + $0xe8] sm:$0xff] }
  0x3b   :  { %554 = vmatpush.bf16.msrb.mxu2 %v1530_v16 }
  0x3e   :  { %350 = vmatpush.bf16.msrb.mxu1 %v1521_v24  ;;  %v57_v24 = vld [vmem:[%s2517_s0 + $0xf8] sm:$0xff] }
  0x3f   :  { %555 = vmatpush.bf16.msrb.mxu2 %v1529_v21  ;;  %v105_v26 = vpack.c.bf16 %v57_v24, %v55_v23  ;;  %v113_v21 = vpack.c.bf16 %v73_v18, %v71_v17  ;;  %v82_v24 = vld [vmem:[%s2517_s0 + $0x1c0] sm:$0xff] }
  0x41   :  { %292 = vmatmul.bf16.gmra.mxu1 %v102_v27  ;;  %272 = vmatmul.bf16.gmra.mxu0 %v94_v36 }
  0x42   :  { %312 = vmatmul.bf16.gmra.mxu2 %v110_v4  ;;  %v80_v4 = vld [vmem:[%s2517_s0 + $0x1b0] sm:$0xff] }
  0x43   :  { %v116_v6 = vpack.c.bf16 %v80_v4, %v78_v3  ;;  %v1549_v3 = vld [vmem:[%s2520_s5 + $0x64] sm:$0xf]  ;;  %v1501_v4 = vld [vmem:[%s2520_s5 + $0x68] sm:$0xf0] }
  0x45   :  { %327 = vmatmul.bf16.gmra.mxu3 %v116_v6 }
  0x51   :  { %297 = vmatmul.bf16.gmra.mxu1 %v104_v33  ;;  %277 = vmatmul.bf16.gmra.mxu0 %v96_v42 }
  0x52   :  { %317 = vmatmul.bf16.gmra.mxu2 %v112_v14 }
  0x61   :  { %351 = vmatmul.bf16.vlgmr.msrb.gmra.mxu1 %v91_v39 }
  0x71   :  { %356 = vmatmul.bf16.gmra.mxu1 %v93_v45  ;;  %v65_v45 = vld [vmem:[%s2517_s0 + $0x138] sm:$0xff] }
  0x72   :  { %v109_v47 = vpack.c.bf16 %v65_v45, %v63_v44  ;;  %v88_v44 = vld [vmem:[%s2517_s0 + $0x1f0] sm:$0xff] }
  0x81   :  { %361 = vmatmul.bf16.gmra.mxu1 %v95_v48 }
  0x91   :  { %366 = vmatmul.bf16.gmra.mxu1 %v97_v55 }
  0x9e   :  { %v2022_v0 = vpop.f32.mrf.mxu1  ;;  %v263_v25 = vpop.f32.mrf.mxu0 }
  0x9f   :  { %v264_v36 = vadd.f32 %v2092_v34, %v263_v25  ;;  %v84_v25 = vld [vmem:[%s2517_s0 + $0x1d0] sm:$0xff] }
  0xa1   :  { %371 = vmatmul.bf16.gmra.mxu1 %v99_v63  ;;  %v111_v63 = vpack.c.bf16 %v69_v61, %v67_v60  ;;  %v1499_v60 = vld [vmem:[%s2520_s5 + $0x60] sm:$0xf]  ;;  %v1550_v61 = vld [vmem:[%s2520_s5 + $0x64] sm:$0xf0] }
  0xa6   :  { %v2033_v5 = vpop.f32.mrf.mxu1  ;;  %v265_v29 = vpop.f32.mrf.mxu0 }
  0xa7   :  { %v266_v37 = vadd.f32 %v2092_v34, %v265_v29 }
  0xae   :  { %v2044_v10 = vpop.f32.mrf.mxu1  ;;  %v268_v35 = vpop.f32.mrf.mxu0 }
  0xaf   :  { %v269_v52 = vadd.f32 %v2092_v34, %v268_v35 }
  0xb1   :  { %376 = vmatmul.bf16.gmra.mxu1 %v101_v9 }
  0xb6   :  { %v2055_v15 = vpop.f32.mrf.mxu1  ;;  %v270_v43 = vpop.f32.mrf.mxu0 }
  0xb7   :  { %v271_v54 = vadd.f32 %v2092_v34, %v270_v43  ;;  %v86_v43 = vld [vmem:[%s2517_s0 + $0x1e0] sm:$0xff]  ;;  %v291_v17 = vadd.f32 %v2092_v34, %v2055_v15  ;;  %v83_v15 = vld [vmem:[%s2517_s0 + $0x1c8] sm:$0xff] }
  0xb8   :  { %v120_v45 = vpack.c.bf16 %v88_v44, %v86_v43  ;;  %v1477_v43 = vld [vmem:[%s2520_s5 + $0x38] sm:$0xf0] }
  0xbe   :  { %v2066_v20 = vpop.f32.mrf.mxu1  ;;  %v273_v53 = vpop.f32.mrf.mxu0 }
  0xbf   :  { %v274_v7 = vadd.f32 %v2092_v34, %v273_v53  ;;  %v1512_v53 = vor.u32 %v1551_v50, %v1509_v51  ;;  %v294_v44 = vadd.f32 %v2092_v34, %v2066_v20  ;;  %v89_v20 = vld [vmem:[%s2517_s0 + $0x1f8] sm:$0xff] }
  0xc1   :  { %381 = vmatmul.bf16.gmra.mxu1 %v103_v19  ;;  %876 = vmatpush.bf16.msrb.mxu0 %v1512_v53 }
  0xc6   :  { %v2071_v22 = vpop.f32.mrf.mxu1  ;;  %v275_v1 = vpop.f32.mrf.mxu0 }
  0xc7   :  { %v276_v8 = vadd.f32 %v2092_v34, %v275_v1 }
  0xce   :  { %v2079_v27 = vpop.f32.mrf.mxu1  ;;  %v278_v13 = vpop.f32.mrf.mxu0 }
  0xcf   :  { %v279_v29 = vadd.f32 %v2092_v34, %v278_v13  ;;  %v1493_v13 = vld [vmem:[%s2520_s5 + $0x58] sm:$0xf0] }
  0xd1   :  { %386 = vmatmul.bf16.gmra.mxu1 %v105_v26  ;;  %v118_v26 = vpack.c.bf16 %v84_v25, %v82_v24 }
  0xd3   :  { %332 = vmatmul.bf16.gmra.mxu3 %v118_v26  ;;  %v1483_v26 = vld [vmem:[%s2520_s5 + $0x40] sm:$0xf] }
  0xd6   :  { %v2081_v28 = vpop.f32.mrf.mxu1  ;;  %v280_v30 = vpop.f32.mrf.mxu0 }
  0xd7   :  { %v281_v31 = vadd.f32 %v2092_v34, %v280_v30 }
  0xde   :  { %v352_v33 = vpop.f32.mrf.mxu1 }
  0xdf   :  { %v353_v38 = vadd.f32 %v352_v33, %v264_v36 }
  0xe1   :  { %391 = vmatmul.bf16.gmra.mxu1 %v107_v32  ;;  %v432_v41 = vmax.f32 %v353_v38, 0.0  ;;  %v75_v38 = vld [vmem:[%s2517_s0 + $0x188] sm:$0xff] }
  0xe3   :  { %337 = vmatmul.bf16.gmra.mxu3 %v120_v45 }
  0xe6   :  { %v354_v39 = vpop.f32.mrf.mxu1 }
  0xe7   :  { %v355_v40 = vadd.f32 %v354_v39, %v266_v37  ;;  %v77_v39 = vld [vmem:[%s2517_s0 + $0x198] sm:$0xff] }
  0xe9   :  { %v433_v42 = vmax.f32 %v355_v40, 0.0 }
  0xeb   :  { %v464_v46 = vpack.c.bf16 %v433_v42, %v432_v41  ;;  %v115_v41 = vpack.c.bf16 %v77_v39, %v75_v38  ;;  %v1475_v39 = vld [vmem:[%s2520_s5 + $0x30] sm:$0xf] }
  0xed   :  { %556 = vmatmul.bf16.vlgmr.msrb.gmra.mxu2 %v464_v46  ;;  %v1507_v46 = vld [vmem:[%s2520_s5 + $0x70] sm:$0xf] }
  0xee   :  { %v357_v48 = vpop.f32.mrf.mxu1 }
  0xef   :  { %v358_v55 = vadd.f32 %v357_v48, %v269_v52  ;;  %v2156_v48 = vpop.f32.mrf.mxu2  ;;  %v284_v52 = vadd.f32 %v2092_v34, %v2022_v0  ;;  %v79_v0 = vld [vmem:[%s2517_s0 + $0x1a8] sm:$0xff] }
  0xf1   :  { %396 = vmatmul.bf16.gmra.mxu1 %v109_v47  ;;  %v434_v58 = vmax.f32 %v358_v55, 0.0  ;;  %v1552_v47 = vld [vmem:[%s2520_s5 + $0x74] sm:$0xf0] }
  0xf2   :  { %v1508_v49 = vor.u32 %v1552_v47, %v1507_v46  ;;  %v296_v46 = vadd.f32 %v2092_v34, %v2071_v22  ;;  %v1467_v22 = vld [vmem:[%s2520_s5 + $0x20] sm:$0xf] }
  0xf4   :  { %787 = vmatpush.bf16.msrb.mxu3 %v1508_v49 }
  0xf6   :  { %v359_v56 = vpop.f32.mrf.mxu1 }
  0xf7   :  { %v360_v57 = vadd.f32 %v359_v56, %v271_v54  ;;  %v286_v54 = vadd.f32 %v2092_v34, %v2033_v5  ;;  %v81_v5 = vld [vmem:[%s2517_s0 + $0x1b8] sm:$0xff]  ;;  %v2180_v1 = vpop.f32.mrf.mxu2 }
  0xf9   :  { %v435_v59 = vmax.f32 %v360_v57, 0.0 }
  0xfb   :  { %v465_v62 = vpack.c.bf16 %v435_v59, %v434_v58 }
  0xfd   :  { %561 = vmatmul.bf16.gmra.mxu2 %v465_v62  ;;  %v1500_v62 = vor.u32 %v1550_v61, %v1499_v60  ;;  %v1469_v60 = vld [vmem:[%s2520_s5 + $0x28] sm:$0xf0] }
  0xfe   :  { %v362_v2 = vpop.f32.mrf.mxu1 }
  0xff   :  { %v363_v9 = vadd.f32 %v362_v2, %v274_v7  ;;  %788 = vmatpush.bf16.msrb.mxu3 %v1500_v62  ;;  %v117_v2 = vpack.c.bf16 %v81_v5, %v79_v0  ;;  %v1504_v7 = vor.u32 %v1549_v3, %v1501_v4  ;;  %v1459_v5 = vld [vmem:[%s2520_s5 + $0x10] sm:$0xf]  ;;  %v1540_v62 = vld [vmem:[%s2520_s5 + $0x14] sm:$0xf0]  ;;  %v1539_v3 = vld [vmem:[%s2520_s5 + $0x14] sm:$0xf] }
 0x100   :  { %v1461_v4 = vld [vmem:[%s2520_s5 + $0x18] sm:$0xf0] }
 0x101   :  { %401 = vmatmul.bf16.gmra.mxu1 %v111_v63  ;;  %v436_v14 = vmax.f32 %v363_v9, 0.0  ;;  %877 = vmatpush.bf16.msrb.mxu0 %v1504_v7  ;;  %v1548_v9 = vld [vmem:[%s2520_s5 + $0x54] sm:$0xf0]  ;;  %v1464_v7 = vor.u32 %v1539_v3, %v1461_v4 }
 0x106   :  { %v364_v11 = vpop.f32.mrf.mxu1 }
 0x107   :  { %v365_v12 = vadd.f32 %v364_v11, %v276_v8  ;;  %v1491_v8 = vld [vmem:[%s2520_s5 + $0x50] sm:$0xf] }
 0x108   :  { %v1492_v11 = vor.u32 %v1548_v9, %v1491_v8  ;;  %v301_v8 = vadd.f32 %v2092_v34, %v2081_v28  ;;  %v1453_v28 = vld [vmem:[%s2520_s5 + $0x8] sm:$0xf0] }
 0x109   :  { %v437_v16 = vmax.f32 %v365_v12, 0.0  ;;  %v1547_v12 = vld [vmem:[%s2520_s5 + $0x54] sm:$0xf] }
 0x10a   :  { %789 = vmatpush.bf16.msrb.mxu3 %v1492_v11 }
 0x10b   :  { %v466_v19 = vpack.c.bf16 %v437_v16, %v436_v14  ;;  %v289_v14 = vadd.f32 %v2092_v34, %v2044_v10  ;;  %v1496_v16 = vor.u32 %v1547_v12, %v1493_v13  ;;  %v1546_v10 = vld [vmem:[%s2520_s5 + $0x44] sm:$0xf0] }
 0x10c   :  { %v1484_v30 = vor.u32 %v1546_v10, %v1483_v26  ;;  %v304_v26 = vadd.f32 %v2092_v34, %v2156_v48  ;;  %v306_v10 = vadd.f32 %v2092_v34, %v2180_v1  ;;  %v2299_v48 = vld [vmem:[%s2519_s4] ss:$0 sm:$0xff] }
 0x10d   :  { %566 = vmatmul.bf16.gmra.mxu2 %v466_v19  ;;  %878 = vmatpush.bf16.msrb.mxu0 %v1496_v16  ;;  %v1538_v16 = vld [vmem:[%s2520_s5 + $0x4] sm:$0xf0] }
 0x10e   :  { %v367_v23 = vpop.f32.mrf.mxu1  ;;  %790 = vmatpush.bf16.msrb.mxu3 %v1484_v30 }
 0x10f   :  { %v368_v32 = vadd.f32 %v367_v23, %v279_v29  ;;  %v85_v29 = vld [vmem:[%s2517_s0 + $0x1d8] sm:$0xff] }
 0x111   :  { %406 = vmatmul.bf16.gmra.mxu1 %v113_v21  ;;  %v438_v36 = vmax.f32 %v368_v32, 0.0  ;;  %v2204_v21 = vpop.f32.mrf.mxu2  ;;  %v119_v32 = vpack.c.bf16 %v85_v29, %v83_v15 }
 0x116   :  { %v369_v33 = vpop.f32.mrf.mxu1 }
 0x117   :  { %v370_v35 = vadd.f32 %v369_v33, %v281_v31  ;;  %v1545_v33 = vld [vmem:[%s2520_s5 + $0x44] sm:$0xf] }
 0x119   :  { %v439_v37 = vmax.f32 %v370_v35, 0.0  ;;  %v1485_v35 = vld [vmem:[%s2520_s5 + $0x48] sm:$0xf0]  ;;  %v2224_v38 = vpop.f32.mrf.mxu2 }
 0x11a   :  { %v311_v1 = vadd.f32 %v2092_v34, %v2224_v38 }
 0x11b   :  { %v467_v40 = vpack.c.bf16 %v439_v37, %v438_v36  ;;  %v1488_v37 = vor.u32 %v1545_v33, %v1485_v35 }
 0x11d   :  { %571 = vmatmul.bf16.gmra.mxu2 %v467_v40  ;;  %879 = vmatpush.bf16.msrb.mxu0 %v1488_v37  ;;  %v1544_v40 = vld [vmem:[%s2520_s5 + $0x34] sm:$0xf0] }
 0x11e   :  { %v372_v42 = vpop.f32.mrf.mxu1 }
 0x11f   :  { %v373_v55 = vadd.f32 %v372_v42, %v284_v52  ;;  %v1543_v42 = vld [vmem:[%s2520_s5 + $0x34] sm:$0xf] }
 0x120   :  { %v1480_v45 = vor.u32 %v1543_v42, %v1477_v43 }
 0x121   :  { %411 = vmatmul.bf16.gmra.mxu1 %v115_v41  ;;  %v440_v58 = vmax.f32 %v373_v55, 0.0  ;;  %v1476_v41 = vor.u32 %v1544_v40, %v1475_v39  ;;  %v2242_v53 = vpop.f32.mrf.mxu2  ;;  %v309_v39 = vadd.f32 %v2092_v34, %v2204_v21 }
 0x122   :  { %880 = vmatpush.bf16.msrb.mxu0 %v1480_v45  ;;  %v314_v38 = vadd.f32 %v2092_v34, %v2242_v53 }
 0x123   :  { %791 = vmatpush.bf16.msrb.mxu3 %v1476_v41 }
 0x126   :  { %v374_v56 = vpop.f32.mrf.mxu1 }
 0x127   :  { %v375_v57 = vadd.f32 %v374_v56, %v286_v54  ;;  %v87_v54 = vld [vmem:[%s2517_s0 + $0x1e8] sm:$0xff] }
 0x128   :  { %v1542_v56 = vld [vmem:[%s2520_s5 + $0x24] sm:$0xf0] }
 0x129   :  { %v441_v59 = vmax.f32 %v375_v57, 0.0  ;;  %v1468_v57 = vor.u32 %v1542_v56, %v1467_v22 }
 0x12b   :  { %v468_v63 = vpack.c.bf16 %v441_v59, %v440_v58  ;;  %v121_v58 = vpack.c.bf16 %v89_v20, %v87_v54  ;;  %v1541_v59 = vld [vmem:[%s2520_s5 + $0x24] sm:$0xf]  ;;  %792 = vmatpush.bf16.msrb.mxu3 %v1468_v57 }
 0x12c   :  { %v1472_v0 = vor.u32 %v1541_v59, %v1469_v60 }
 0x12d   :  { %576 = vmatmul.bf16.gmra.mxu2 %v468_v63  ;;  %v1460_v63 = vor.u32 %v1540_v62, %v1459_v5 }
 0x12e   :  { %v377_v6 = vpop.f32.mrf.mxu1  ;;  %881 = vmatpush.bf16.msrb.mxu0 %v1472_v0 }
 0x12f   :  { %v378_v18 = vadd.f32 %v377_v6, %v289_v14  ;;  %v315_v6 = vpop.f32.mrf.mxu2  ;;  %793 = vmatpush.bf16.msrb.mxu3 %v1460_v63  ;;  %v1451_v14 = vld [vmem:[%s2520_s5] sm:$0xf]  ;;  %v323_v63 = vpop.f32.mrf.mxu3 }
 0x130   :  { %v316_v20 = vadd.f32 %v2092_v34, %v315_v6 }
 0x131   :  { %416 = vmatmul.bf16.gmra.mxu1 %v117_v2  ;;  %v442_v24 = vmax.f32 %v378_v18, 0.0  ;;  %v299_v2 = vadd.f32 %v2092_v34, %v2079_v27  ;;  %v1537_v18 = vld [vmem:[%s2520_s5 + $0x4] sm:$0xf] }
 0x132   :  { %882 = vmatpush.bf16.msrb.mxu0 %v1464_v7 }
 0x136   :  { %v379_v19 = vpop.f32.mrf.mxu1 }
 0x137   :  { %v380_v23 = vadd.f32 %v379_v19, %v291_v17  ;;  %v1452_v17 = vor.u32 %v1538_v16, %v1451_v14 }
 0x139   :  { %v443_v25 = vmax.f32 %v380_v23, 0.0  ;;  %v1456_v23 = vor.u32 %v1537_v18, %v1453_v28  ;;  %794 = vmatpush.bf16.msrb.mxu3 %v1452_v17 }
 0x13b   :  { %v469_v31 = vpack.c.bf16 %v443_v25, %v442_v24  ;;  %883 = vmatpush.bf16.msrb.mxu0 %v1456_v23  ;;  %v318_v24 = vpop.f32.mrf.mxu2 }
 0x13c   :  { %v319_v4 = vadd.f32 %v2092_v34, %v318_v24 }
 0x13d   :  { %581 = vmatmul.bf16.gmra.mxu2 %v469_v31 }
 0x13e   :  { %v382_v36 = vpop.f32.mrf.mxu1 }
 0x13f   :  { %v383_v47 = vadd.f32 %v382_v36, %v294_v44 }
 0x141   :  { %421 = vmatmul.bf16.gmra.mxu1 %v119_v32  ;;  %v444_v51 = vmax.f32 %v383_v47, 0.0 }
 0x143   :  { %v320_v31 = vpop.f32.mrf.mxu2 }
 0x144   :  { %v321_v6 = vadd.f32 %v2092_v34, %v320_v31 }
 0x146   :  { %v384_v49 = vpop.f32.mrf.mxu1 }
 0x147   :  { %v385_v50 = vadd.f32 %v384_v49, %v296_v46 }
 0x149   :  { %v445_v52 = vmax.f32 %v385_v50, 0.0 }
 0x14b   :  { %v470_v55 = vpack.c.bf16 %v445_v52, %v444_v51 }
 0x14d   :  { %586 = vmatmul.bf16.gmra.mxu2 %v470_v55 }
 0x14e   :  { %v387_v61 = vpop.f32.mrf.mxu1 }
 0x14f   :  { %v388_v9 = vadd.f32 %v387_v61, %v299_v2 }
 0x151   :  { %426 = vmatmul.bf16.gmra.mxu1 %v121_v58  ;;  %v446_v13 = vmax.f32 %v388_v9, 0.0  ;;  %v325_v9 = vpop.f32.mrf.mxu3 }
 0x156   :  { %v389_v11 = vpop.f32.mrf.mxu1 }
 0x157   :  { %v390_v12 = vadd.f32 %v389_v11, %v301_v8 }
 0x159   :  { %v447_v27 = vmax.f32 %v390_v12, 0.0 }
 0x15b   :  { %v471_v19 = vpack.c.bf16 %v447_v27, %v446_v13 }
 0x15d   :  { %591 = vmatmul.bf16.gmra.mxu2 %v471_v19 }
 0x15e   :  { %v392_v25 = vpop.f32.mrf.mxu1 }
 0x15f   :  { %v393_v15 = vadd.f32 %v392_v25, %v304_v26  ;;  %v328_v25 = vpop.f32.mrf.mxu3  ;;  %v324_v26 = vadd.f32 %v2092_v34, %v323_v63 }
 0x161   :  { %v448_v32 = vmax.f32 %v393_v15, 0.0 }
 0x166   :  { %v394_v29 = vpop.f32.mrf.mxu1 }
 0x167   :  { %v395_v30 = vadd.f32 %v394_v29, %v306_v10  ;;  %v326_v10 = vadd.f32 %v2092_v34, %v325_v9 }
 0x169   :  { %v449_v33 = vmax.f32 %v395_v30, 0.0 }
 0x16b   :  { %v472_v35 = vpack.c.bf16 %v449_v33, %v448_v32 }
 0x16d   :  { %596 = vmatmul.bf16.gmra.mxu2 %v472_v35 }
 0x16e   :  { %v397_v36 = vpop.f32.mrf.mxu1 }
 0x16f   :  { %v398_v40 = vadd.f32 %v397_v36, %v309_v39 }
 0x170   :  { %v557_v37 = vpop.f32.mrf.mxu2 }
 0x171   :  { %v558_v42 = vadd.f32 %v2299_v48, %v557_v37  ;;  %v450_v45 = vmax.f32 %v398_v40, 0.0  ;;  %v330_v37 = vpop.f32.mrf.mxu3 }
 0x173   :  { %v637_v49 = vmax.f32 %v558_v42, 0.0 }
 0x176   :  { %v399_v41 = vpop.f32.mrf.mxu1 }
 0x177   :  { %v400_v43 = vadd.f32 %v399_v41, %v311_v1 }
 0x178   :  { %v559_v44 = vpop.f32.mrf.mxu2 }
 0x179   :  { %v451_v46 = vmax.f32 %v400_v43, 0.0  ;;  %v560_v47 = vadd.f32 %v2299_v48, %v559_v44  ;;  %v329_v44 = vadd.f32 %v2092_v34, %v328_v25 }
 0x17b   :  { %v473_v21 = vpack.c.bf16 %v451_v46, %v450_v45  ;;  %v638_v50 = vmax.f32 %v560_v47, 0.0  ;;  %v333_v45 = vpop.f32.mrf.mxu3  ;;  %v331_v46 = vadd.f32 %v2092_v34, %v330_v37 }
 0x17d   :  { %601 = vmatmul.bf16.gmra.mxu2 %v473_v21  ;;  %v669_v51 = vpack.c.bf16 %v638_v50, %v637_v49 }
 0x17e   :  { %v402_v52 = vpop.f32.mrf.mxu1 }
 0x17f   :  { %795 = vmatmul.bf16.vlgmr.msrb.gmra.mxu3 %v669_v51  ;;  %884 = vmatmul.bf16.vlgmr.msrb.gmra.mxu0 %v669_v51  ;;  %v403_v55 = vadd.f32 %v402_v52, %v314_v38 }
 0x180   :  { %v562_v54 = vpop.f32.mrf.mxu2 }
 0x181   :  { %v563_v56 = vadd.f32 %v2299_v48, %v562_v54  ;;  %v452_v59 = vmax.f32 %v403_v55, 0.0 }
 0x183   :  { %v639_v0 = vmax.f32 %v563_v56, 0.0 }
 0x186   :  { %v404_v22 = vpop.f32.mrf.mxu1 }
 0x187   :  { %v405_v57 = vadd.f32 %v404_v22, %v316_v20 }
 0x188   :  { %v564_v58 = vpop.f32.mrf.mxu2 }
 0x189   :  { %v453_v60 = vmax.f32 %v405_v57, 0.0  ;;  %v565_v61 = vadd.f32 %v2299_v48, %v564_v58  ;;  %v335_v57 = vpop.f32.mrf.mxu3 }
 0x18b   :  { %v474_v5 = vpack.c.bf16 %v453_v60, %v452_v59  ;;  %v640_v62 = vmax.f32 %v565_v61, 0.0  ;;  %v334_v60 = vadd.f32 %v2092_v34, %v333_v45  ;;  %v336_v61 = vadd.f32 %v2092_v34, %v335_v57 }
 0x18d   :  { %606 = vmatmul.bf16.gmra.mxu2 %v474_v5  ;;  %v670_v2 = vpack.c.bf16 %v640_v62, %v639_v0 }
 0x18e   :  { %v407_v3 = vpop.f32.mrf.mxu1 }
 0x18f   :  { %800 = vmatmul.bf16.gmra.mxu3 %v670_v2  ;;  %889 = vmatmul.bf16.gmra.mxu0 %v670_v2  ;;  %v408_v7 = vadd.f32 %v407_v3, %v319_v4 }
 0x190   :  { %v567_v53 = vpop.f32.mrf.mxu2 }
 0x191   :  { %v568_v11 = vadd.f32 %v2299_v48, %v567_v53  ;;  %v454_v27 = vmax.f32 %v408_v7, 0.0  ;;  %v338_v2 = vpop.f32.mrf.mxu3 }
 0x193   :  { %v641_v17 = vmax.f32 %v568_v11, 0.0 }
 0x196   :  { %v409_v8 = vpop.f32.mrf.mxu1 }
 0x197   :  { %v410_v12 = vadd.f32 %v409_v8, %v321_v6 }
 0x198   :  { %v569_v13 = vpop.f32.mrf.mxu2 }
 0x199   :  { %v455_v14 = vmax.f32 %v410_v12, 0.0  ;;  %v570_v16 = vadd.f32 %v2299_v48, %v569_v13 }
 0x19b   :  { %v475_v18 = vpack.c.bf16 %v455_v14, %v454_v27  ;;  %v642_v28 = vmax.f32 %v570_v16, 0.0  ;;  %v339_v27 = vadd.f32 %v2092_v34, %v338_v2  ;;  %v340_v14 = vpop.f32.mrf.mxu3 }
 0x19c   :  { %v341_v16 = vadd.f32 %v2092_v34, %v340_v14 }
 0x19d   :  { %611 = vmatmul.bf16.gmra.mxu2 %v475_v18  ;;  %v671_v19 = vpack.c.bf16 %v642_v28, %v641_v17 }
 0x19e   :  { %v412_v23 = vpop.f32.mrf.mxu1 }
 0x19f   :  { %805 = vmatmul.bf16.gmra.mxu3 %v671_v19  ;;  %894 = vmatmul.bf16.gmra.mxu0 %v671_v19  ;;  %v413_v15 = vadd.f32 %v412_v23, %v324_v26 }
 0x1a0   :  { %v572_v24 = vpop.f32.mrf.mxu2 }
 0x1a1   :  { %v573_v30 = vadd.f32 %v2299_v48, %v572_v24  ;;  %v456_v33 = vmax.f32 %v413_v15, 0.0 }
 0x1a3   :  { %v643_v39 = vmax.f32 %v573_v30, 0.0 }
 0x1a6   :  { %v414_v29 = vpop.f32.mrf.mxu1 }
 0x1a7   :  { %v415_v31 = vadd.f32 %v414_v29, %v326_v10 }
 0x1a8   :  { %v574_v32 = vpop.f32.mrf.mxu2 }
 0x1a9   :  { %v457_v35 = vmax.f32 %v415_v31, 0.0  ;;  %v575_v36 = vadd.f32 %v2299_v48, %v574_v32 }
 0x1ab   :  { %v476_v1 = vpack.c.bf16 %v457_v35, %v456_v33  ;;  %v644_v40 = vmax.f32 %v575_v36, 0.0 }
 0x1ad   :  { %616 = vmatmul.bf16.gmra.mxu2 %v476_v1  ;;  %v672_v41 = vpack.c.bf16 %v644_v40, %v643_v39  ;;  %v701_v1 = vld [vmem:[%s2521_s6] sm:$0x3] }
 0x1ae   :  { %v417_v42 = vpop.f32.mrf.mxu1 }
 0x1af   :  { %810 = vmatmul.bf16.gmra.mxu3 %v672_v41  ;;  %899 = vmatmul.bf16.gmra.mxu0 %v672_v41  ;;  %v418_v47 = vadd.f32 %v417_v42, %v329_v44 }
 0x1b0   :  { %v577_v43 = vpop.f32.mrf.mxu2 }
 0x1b1   :  { %v578_v21 = vadd.f32 %v2299_v48, %v577_v43  ;;  %v458_v52 = vmax.f32 %v418_v47, 0.0  ;;  %v2337_v43 = vperm.slane %v701_v1, 1 }
 0x1b3   :  { %v645_v20 = vmax.f32 %v578_v21, 0.0 }
 0x1b6   :  { %v419_v49 = vpop.f32.mrf.mxu1 }
 0x1b7   :  { %v420_v50 = vadd.f32 %v419_v49, %v331_v46 }
 0x1b8   :  { %v579_v51 = vpop.f32.mrf.mxu2 }
 0x1b9   :  { %v459_v54 = vmax.f32 %v420_v50, 0.0  ;;  %v580_v38 = vadd.f32 %v2299_v48, %v579_v51  ;;  %v2340_v50 = vperm.slane %v701_v1, 0 }
 0x1bb   :  { %v477_v55 = vpack.c.bf16 %v459_v54, %v458_v52  ;;  %v646_v22 = vmax.f32 %v580_v38, 0.0 }
 0x1bd   :  { %621 = vmatmul.bf16.gmra.mxu2 %v477_v55  ;;  %v673_v56 = vpack.c.bf16 %v646_v22, %v645_v20 }
 0x1be   :  { %v422_v58 = vpop.f32.mrf.mxu1 }
 0x1bf   :  { %815 = vmatmul.bf16.gmra.mxu3 %v673_v56  ;;  %904 = vmatmul.bf16.gmra.mxu0 %v673_v56  ;;  %v423_v0 = vadd.f32 %v422_v58, %v334_v60 }
 0x1c0   :  { %v582_v59 = vpop.f32.mrf.mxu2 }
 0x1c1   :  { %v583_v62 = vadd.f32 %v2299_v48, %v582_v59  ;;  %v460_v53 = vmax.f32 %v423_v0, 0.0 }
 0x1c3   :  { %v647_v7 = vmax.f32 %v583_v62, 0.0 }
 0x1c6   :  { %v424_v5 = vpop.f32.mrf.mxu1 }
 0x1c7   :  { %v425_v63 = vadd.f32 %v424_v5, %v336_v61 }
 0x1c8   :  { %v584_v3 = vpop.f32.mrf.mxu2 }
 0x1c9   :  { %v461_v4 = vmax.f32 %v425_v63, 0.0  ;;  %v585_v6 = vadd.f32 %v2299_v48, %v584_v3 }
 0x1cb   :  { %v478_v8 = vpack.c.bf16 %v461_v4, %v460_v53  ;;  %v648_v9 = vmax.f32 %v585_v6, 0.0 }
 0x1cd   :  { %626 = vmatmul.bf16.gmra.mxu2 %v478_v8  ;;  %v674_v11 = vpack.c.bf16 %v648_v9, %v647_v7 }
 0x1ce   :  { %v427_v12 = vpop.f32.mrf.mxu1 }
 0x1cf   :  { %820 = vmatmul.bf16.gmra.mxu3 %v674_v11  ;;  %909 = vmatmul.bf16.gmra.mxu0 %v674_v11  ;;  %v428_v17 = vadd.f32 %v427_v12, %v339_v27 }
 0x1d0   :  { %v587_v13 = vpop.f32.mrf.mxu2 }
 0x1d1   :  { %v588_v28 = vadd.f32 %v2299_v48, %v587_v13  ;;  %v462_v24 = vmax.f32 %v428_v17, 0.0 }
 0x1d3   :  { %v649_v10 = vmax.f32 %v588_v28, 0.0 }
 0x1d6   :  { %v429_v18 = vpop.f32.mrf.mxu1 }
 0x1d7   :  { %v430_v19 = vadd.f32 %v429_v18, %v341_v16 }
 0x1d8   :  { %v589_v23 = vpop.f32.mrf.mxu2 }
 0x1d9   :  { %v463_v25 = vmax.f32 %v430_v19, 0.0  ;;  %v590_v26 = vadd.f32 %v2299_v48, %v589_v23 }
 0x1db   :  { %v479_v15 = vpack.c.bf16 %v463_v25, %v462_v24  ;;  %v650_v29 = vmax.f32 %v590_v26, 0.0 }
 0x1dd   :  { %631 = vmatmul.bf16.gmra.mxu2 %v479_v15  ;;  %v675_v30 = vpack.c.bf16 %v650_v29, %v649_v10 }
 0x1df   :  { %825 = vmatmul.bf16.gmra.mxu3 %v675_v30  ;;  %914 = vmatmul.bf16.gmra.mxu0 %v675_v30 }
 0x1e0   :  { %v592_v31 = vpop.f32.mrf.mxu2 }
 0x1e1   :  { %v593_v34 = vadd.f32 %v2299_v48, %v592_v31 }
 0x1e3   :  { %v651_v35 = vmax.f32 %v593_v34, 0.0 }
 0x1e8   :  { %v594_v32 = vpop.f32.mrf.mxu2 }
 0x1e9   :  { %v595_v33 = vadd.f32 %v2299_v48, %v594_v32 }
 0x1eb   :  { %v652_v36 = vmax.f32 %v595_v33, 0.0 }
 0x1ed   :  { %v676_v37 = vpack.c.bf16 %v652_v36, %v651_v35 }
 0x1ef   :  { %830 = vmatmul.bf16.gmra.mxu3 %v676_v37  ;;  %919 = vmatmul.bf16.gmra.mxu0 %v676_v37 }
 0x1f0   :  { %v597_v39 = vpop.f32.mrf.mxu2 }
 0x1f1   :  { %v598_v40 = vadd.f32 %v2299_v48, %v597_v39 }
 0x1f3   :  { %v653_v44 = vmax.f32 %v598_v40, 0.0 }
 0x1f8   :  { %v599_v41 = vpop.f32.mrf.mxu2 }
 0x1f9   :  { %v600_v42 = vadd.f32 %v2299_v48, %v599_v41 }
 0x1fb   :  { %v654_v45 = vmax.f32 %v600_v42, 0.0 }
 0x1fc   :  { %v885_v46 = vpop.f32.mrf.mxu0 }
 0x1fd   :  { %v677_v47 = vpack.c.bf16 %v654_v45, %v653_v44  ;;  %v886_v49 = vadd.f32 %v885_v46, %v2337_v43 }
 0x1ff   :  { %v966_v21 = vsub.f32 0.0, %v886_v49  ;;  %835 = vmatmul.bf16.gmra.mxu3 %v677_v47  ;;  %924 = vmatmul.bf16.gmra.mxu0 %v677_v47 }
 0x200   :  { %v602_v51 = vpop.f32.mrf.mxu2 }
 0x201   :  { %v1031_v52 = vmul.f32 1.442695, %v966_v21  ;;  %v603_v56 = vadd.f32 %v2299_v48, %v602_v51 }
 0x202   :  { %v796_v54 = vpop.f32.mrf.mxu3 }
 0x203   :  { %1579 = vpow2.f32 %v1031_v52  ;;  %v797_v38 = vadd.f32 %v796_v54, %v2340_v50  ;;  %v655_v62 = vmax.f32 %v603_v56, 0.0 }
 0x204   :  { %v887_v20 = vpop.f32.mrf.mxu0 }
 0x205   :  { %v965_v55 = vsub.f32 0.0, %v797_v38  ;;  %v888_v22 = vadd.f32 %v887_v20, %v2337_v43 }
 0x207   :  { %v1029_v57 = vmul.f32 1.442695, %v965_v55  ;;  %v968_v58 = vsub.f32 0.0, %v888_v22 }
 0x208   :  { %v604_v59 = vpop.f32.mrf.mxu2 }
 0x209   :  { %v1580_v60 = vpop.eup %1579  ;;  %1581 = vpow2.f32 %v1029_v57  ;;  %v1035_v61 = vmul.f32 1.442695, %v968_v58  ;;  %v605_v0 = vadd.f32 %v2299_v48, %v604_v59 }
 0x20a   :  { %v798_v5 = vpop.f32.mrf.mxu3  ;;  %v1158_v3 = vadd.f32 1.0, %v1580_v60 }
 0x20b   :  { %1583 = vpow2.f32 %v1035_v61  ;;  %v656_v63 = vmax.f32 %v605_v0, 0.0  ;;  %v799_v2 = vadd.f32 %v798_v5, %v2340_v50 }
 0x20c   :  { %v890_v53 = vpop.f32.mrf.mxu0  ;;  %1585 = vrcp.f32 %v1158_v3 }
 0x20d   :  { %v678_v4 = vpack.c.bf16 %v656_v63, %v655_v62  ;;  %v967_v6 = vsub.f32 0.0, %v799_v2  ;;  %v891_v7 = vadd.f32 %v890_v53, %v2337_v43 }
 0x20f   :  { %v1582_v8 = vpop.eup %1581  ;;  %v1033_v9 = vmul.f32 1.442695, %v967_v6  ;;  %v970_v11 = vsub.f32 0.0, %v891_v7  ;;  %840 = vmatmul.bf16.gmra.mxu3 %v678_v4  ;;  %929 = vmatmul.bf16.gmra.mxu0 %v678_v4 }
 0x210   :  { %v1157_v12 = vadd.f32 1.0, %v1582_v8  ;;  %v607_v13 = vpop.f32.mrf.mxu2 }
 0x211   :  { %v1584_v27 = vpop.eup %1583  ;;  %1587 = vpow2.f32 %v1033_v9  ;;  %v1039_v14 = vmul.f32 1.442695, %v970_v11  ;;  %v608_v26 = vadd.f32 %v2299_v48, %v607_v13 }
 0x212   :  { %1589 = vrcp.f32 %v1157_v12  ;;  %v801_v16 = vpop.f32.mrf.mxu3  ;;  %v1160_v18 = vadd.f32 1.0, %v1584_v27  ;;  %v1586_v24 = vpop.eup %1585 }
 0x213   :  { %1591 = vpow2.f32 %v1039_v14  ;;  %v802_v17 = vadd.f32 %v801_v16, %v2340_v50  ;;  %v657_v37 = vmax.f32 %v608_v26, 0.0 }
 0x214   :  { %v892_v28 = vpop.f32.mrf.mxu0  ;;  %1593 = vrcp.f32 %v1160_v18 }
 0x215   :  { %v969_v19 = vsub.f32 0.0, %v802_v17  ;;  %v893_v23 = vadd.f32 %v892_v28, %v2337_v43 }
 0x217   :  { %v1588_v25 = vpop.eup %1587  ;;  %v1037_v10 = vmul.f32 1.442695, %v969_v19  ;;  %v972_v15 = vsub.f32 0.0, %v893_v23 }
 0x218   :  { %v1590_v29 = vpop.eup %1589  ;;  %v1159_v30 = vadd.f32 1.0, %v1588_v25  ;;  %v609_v31 = vpop.f32.mrf.mxu2 }
 0x219   :  { %v1592_v34 = vpop.eup %1591  ;;  %v1285_v32 = vpack.c.bf16 %v1586_v24, %v1590_v29  ;;  %1595 = vpow2.f32 %v1037_v10  ;;  %v1043_v33 = vmul.f32 1.442695, %v972_v15  ;;  %v610_v35 = vadd.f32 %v2299_v48, %v609_v31 }
 0x21a   :  { %1597 = vrcp.f32 %v1159_v30  ;;  %v803_v36 = vpop.f32.mrf.mxu3  ;;  %v1162_v40 = vadd.f32 1.0, %v1592_v34  ;;  %v1594_v46 = vpop.eup %1593 }
 0x21b   :  { %1317 = vst [vmem:[%s2522_s7] sm:$0xff] %v1285_v32  ;;  %1599 = vpow2.f32 %v1043_v33  ;;  %v658_v39 = vmax.f32 %v610_v35, 0.0  ;;  %v804_v1 = vadd.f32 %v803_v36, %v2340_v50 }
 0x21c   :  { %v895_v41 = vpop.f32.mrf.mxu0  ;;  %1601 = vrcp.f32 %v1162_v40 }
 0x21d   :  { %v679_v42 = vpack.c.bf16 %v658_v39, %v657_v37  ;;  %v971_v44 = vsub.f32 0.0, %v804_v1  ;;  %v896_v45 = vadd.f32 %v895_v41, %v2337_v43 }
 0x21f   :  { %v1596_v47 = vpop.eup %1595  ;;  %v1041_v49 = vmul.f32 1.442695, %v971_v44  ;;  %v974_v21 = vsub.f32 0.0, %v896_v45  ;;  %845 = vmatmul.bf16.gmra.mxu3 %v679_v42  ;;  %934 = vmatmul.bf16.gmra.mxu0 %v679_v42 }
 0x220   :  { %v1598_v51 = vpop.eup %1597  ;;  %v1161_v52 = vadd.f32 1.0, %v1596_v47  ;;  %v612_v54 = vpop.f32.mrf.mxu2 }
 0x221   :  { %v1600_v38 = vpop.eup %1599  ;;  %v1286_v20 = vpack.c.bf16 %v1594_v46, %v1598_v51  ;;  %1603 = vpow2.f32 %v1041_v49  ;;  %v1047_v55 = vmul.f32 1.442695, %v974_v21  ;;  %v613_v5 = vadd.f32 %v2299_v48, %v612_v54 }
 0x222   :  { %1605 = vrcp.f32 %v1161_v52  ;;  %v806_v22 = vpop.f32.mrf.mxu3  ;;  %v1164_v57 = vadd.f32 1.0, %v1600_v38  ;;  %v1602_v61 = vpop.eup %1601 }
 0x223   :  { %1318 = vst [vmem:[%s2522_s7 + $0x8] sm:$0xff] %v1286_v20  ;;  %1607 = vpow2.f32 %v1047_v55  ;;  %v807_v56 = vadd.f32 %v806_v22, %v2340_v50  ;;  %v659_v11 = vmax.f32 %v613_v5, 0.0 }
 0x224   :  { %v897_v58 = vpop.f32.mrf.mxu0  ;;  %1609 = vrcp.f32 %v1164_v57 }
 0x225   :  { %v973_v59 = vsub.f32 0.0, %v807_v56  ;;  %v898_v60 = vadd.f32 %v897_v58, %v2337_v43 }
 0x227   :  { %v1604_v0 = vpop.eup %1603  ;;  %v1045_v62 = vmul.f32 1.442695, %v973_v59  ;;  %v976_v63 = vsub.f32 0.0, %v898_v60 }
 0x228   :  { %v1606_v2 = vpop.eup %1605  ;;  %v1163_v3 = vadd.f32 1.0, %v1604_v0  ;;  %v614_v53 = vpop.f32.mrf.mxu2 }
 0x229   :  { %v1608_v4 = vpop.eup %1607  ;;  %v1287_v6 = vpack.c.bf16 %v1602_v61, %v1606_v2  ;;  %1611 = vpow2.f32 %v1045_v62  ;;  %v1051_v7 = vmul.f32 1.442695, %v976_v63  ;;  %v615_v8 = vadd.f32 %v2299_v48, %v614_v53 }
 0x22a   :  { %1613 = vrcp.f32 %v1163_v3  ;;  %v808_v9 = vpop.f32.mrf.mxu3  ;;  %v1166_v27 = vadd.f32 1.0, %v1608_v4  ;;  %v1610_v28 = vpop.eup %1609 }
 0x22b   :  { %1319 = vst [vmem:[%s2522_s7 + $0x10] sm:$0xff] %v1287_v6  ;;  %1615 = vpow2.f32 %v1051_v7  ;;  %v660_v12 = vmax.f32 %v615_v8, 0.0  ;;  %v809_v13 = vadd.f32 %v808_v9, %v2340_v50 }
 0x22c   :  { %v900_v14 = vpop.f32.mrf.mxu0  ;;  %1617 = vrcp.f32 %v1166_v27 }
 0x22d   :  { %v680_v16 = vpack.c.bf16 %v660_v12, %v659_v11  ;;  %v975_v17 = vsub.f32 0.0, %v809_v13  ;;  %v901_v18 = vadd.f32 %v900_v14, %v2337_v43 }
 0x22f   :  { %v1612_v19 = vpop.eup %1611  ;;  %v1049_v23 = vmul.f32 1.442695, %v975_v17  ;;  %v978_v24 = vsub.f32 0.0, %v901_v18  ;;  %850 = vmatmul.bf16.gmra.mxu3 %v680_v16  ;;  %939 = vmatmul.bf16.gmra.mxu0 %v680_v16 }
 0x230   :  { %v1614_v25 = vpop.eup %1613  ;;  %v1165_v26 = vadd.f32 1.0, %v1612_v19  ;;  %v617_v10 = vpop.f32.mrf.mxu2 }
 0x231   :  { %v1616_v15 = vpop.eup %1615  ;;  %v1288_v29 = vpack.c.bf16 %v1610_v28, %v1614_v25  ;;  %1619 = vpow2.f32 %v1049_v23  ;;  %v1055_v30 = vmul.f32 1.442695, %v978_v24  ;;  %v618_v1 = vadd.f32 %v2299_v48, %v617_v10 }
 0x232   :  { %1621 = vrcp.f32 %v1165_v26  ;;  %v811_v31 = vpop.f32.mrf.mxu3  ;;  %v1168_v32 = vadd.f32 1.0, %v1616_v15  ;;  %v1618_v37 = vpop.eup %1617 }
 0x233   :  { %1320 = vst [vmem:[%s2522_s7 + $0x18] sm:$0xff] %v1288_v29  ;;  %1623 = vpow2.f32 %v1055_v30  ;;  %v812_v34 = vadd.f32 %v811_v31, %v2340_v50  ;;  %v661_v52 = vmax.f32 %v618_v1, 0.0 }
 0x234   :  { %v902_v33 = vpop.f32.mrf.mxu0  ;;  %1625 = vrcp.f32 %v1168_v32 }
 0x235   :  { %v977_v35 = vsub.f32 0.0, %v812_v34  ;;  %v903_v36 = vadd.f32 %v902_v33, %v2337_v43 }
 0x237   :  { %v1620_v39 = vpop.eup %1619  ;;  %v1053_v40 = vmul.f32 1.442695, %v977_v35  ;;  %v980_v41 = vsub.f32 0.0, %v903_v36 }
 0x238   :  { %v1622_v42 = vpop.eup %1621  ;;  %v1167_v44 = vadd.f32 1.0, %v1620_v39  ;;  %v619_v45 = vpop.f32.mrf.mxu2 }
 0x239   :  { %v1624_v46 = vpop.eup %1623  ;;  %v1289_v47 = vpack.c.bf16 %v1618_v37, %v1622_v42  ;;  %1627 = vpow2.f32 %v1053_v40  ;;  %v1059_v49 = vmul.f32 1.442695, %v980_v41  ;;  %v620_v21 = vadd.f32 %v2299_v48, %v619_v45 }
 0x23a   :  { %1629 = vrcp.f32 %v1167_v44  ;;  %v813_v51 = vpop.f32.mrf.mxu3  ;;  %v1170_v20 = vadd.f32 1.0, %v1624_v46  ;;  %v1626_v58 = vpop.eup %1625 }
 0x23b   :  { %1321 = vst [vmem:[%s2522_s7 + $0x20] sm:$0xff] %v1289_v47  ;;  %1631 = vpow2.f32 %v1059_v49  ;;  %v662_v54 = vmax.f32 %v620_v21, 0.0  ;;  %v814_v38 = vadd.f32 %v813_v51, %v2340_v50 }
 0x23c   :  { %v905_v55 = vpop.f32.mrf.mxu0  ;;  %1633 = vrcp.f32 %v1170_v20 }
 0x23d   :  { %v681_v22 = vpack.c.bf16 %v662_v54, %v661_v52  ;;  %v979_v56 = vsub.f32 0.0, %v814_v38  ;;  %v906_v57 = vadd.f32 %v905_v55, %v2337_v43 }
 0x23f   :  { %v1628_v59 = vpop.eup %1627  ;;  %v1057_v60 = vmul.f32 1.442695, %v979_v56  ;;  %v982_v61 = vsub.f32 0.0, %v906_v57  ;;  %855 = vmatmul.bf16.gmra.mxu3 %v681_v22  ;;  %944 = vmatmul.bf16.gmra.mxu0 %v681_v22 }
 0x240   :  { %v1630_v0 = vpop.eup %1629  ;;  %v1169_v5 = vadd.f32 1.0, %v1628_v59  ;;  %v622_v62 = vpop.f32.mrf.mxu2 }
 0x241   :  { %v1632_v63 = vpop.eup %1631  ;;  %v1290_v2 = vpack.c.bf16 %v1626_v58, %v1630_v0  ;;  %1635 = vpow2.f32 %v1057_v60  ;;  %v1063_v3 = vmul.f32 1.442695, %v982_v61  ;;  %v623_v13 = vadd.f32 %v2299_v48, %v622_v62 }
 0x242   :  { %1637 = vrcp.f32 %v1169_v5  ;;  %v816_v53 = vpop.f32.mrf.mxu3  ;;  %v1172_v6 = vadd.f32 1.0, %v1632_v63  ;;  %v1634_v11 = vpop.eup %1633 }
 0x243   :  { %1322 = vst [vmem:[%s2522_s7 + $0x28] sm:$0xff] %v1290_v2  ;;  %1639 = vpow2.f32 %v1063_v3  ;;  %v817_v4 = vadd.f32 %v816_v53, %v2340_v50  ;;  %v663_v26 = vmax.f32 %v623_v13, 0.0 }
 0x244   :  { %v907_v7 = vpop.f32.mrf.mxu0  ;;  %1641 = vrcp.f32 %v1172_v6 }
 0x245   :  { %v981_v8 = vsub.f32 0.0, %v817_v4  ;;  %v908_v9 = vadd.f32 %v907_v7, %v2337_v43 }
 0x247   :  { %v1636_v12 = vpop.eup %1635  ;;  %v1061_v27 = vmul.f32 1.442695, %v981_v8  ;;  %v984_v14 = vsub.f32 0.0, %v908_v9 }
 0x248   :  { %v1638_v16 = vpop.eup %1637  ;;  %v1171_v17 = vadd.f32 1.0, %v1636_v12  ;;  %v624_v18 = vpop.f32.mrf.mxu2 }
 0x249   :  { %v1640_v28 = vpop.eup %1639  ;;  %v1291_v19 = vpack.c.bf16 %v1634_v11, %v1638_v16  ;;  %1643 = vpow2.f32 %v1061_v27  ;;  %v1067_v23 = vmul.f32 1.442695, %v984_v14  ;;  %v625_v24 = vadd.f32 %v2299_v48, %v624_v18 }
 0x24a   :  { %1645 = vrcp.f32 %v1171_v17  ;;  %v818_v25 = vpop.f32.mrf.mxu3  ;;  %v1174_v29 = vadd.f32 1.0, %v1640_v28  ;;  %v1642_v33 = vpop.eup %1641 }
 0x24b   :  { %1323 = vst [vmem:[%s2522_s7 + $0x30] sm:$0xff] %v1291_v19  ;;  %1647 = vpow2.f32 %v1067_v23  ;;  %v664_v10 = vmax.f32 %v625_v24, 0.0  ;;  %v819_v15 = vadd.f32 %v818_v25, %v2340_v50 }
 0x24c   :  { %v910_v30 = vpop.f32.mrf.mxu0  ;;  %1649 = vrcp.f32 %v1174_v29 }
 0x24d   :  { %v682_v31 = vpack.c.bf16 %v664_v10, %v663_v26  ;;  %v983_v34 = vsub.f32 0.0, %v819_v15  ;;  %v911_v32 = vadd.f32 %v910_v30, %v2337_v43 }
 0x24f   :  { %v1644_v35 = vpop.eup %1643  ;;  %v1065_v36 = vmul.f32 1.442695, %v983_v34  ;;  %v986_v37 = vsub.f32 0.0, %v911_v32  ;;  %860 = vmatmul.bf16.gmra.mxu3 %v682_v31  ;;  %949 = vmatmul.bf16.gmra.mxu0 %v682_v31 }
 0x250   :  { %v1646_v39 = vpop.eup %1645  ;;  %v1173_v1 = vadd.f32 1.0, %v1644_v35  ;;  %v627_v40 = vpop.f32.mrf.mxu2 }
 0x251   :  { %v1648_v41 = vpop.eup %1647  ;;  %v1292_v42 = vpack.c.bf16 %v1642_v33, %v1646_v39  ;;  %1651 = vpow2.f32 %v1065_v36  ;;  %v1071_v44 = vmul.f32 1.442695, %v986_v37  ;;  %v628_v38 = vadd.f32 %v2299_v48, %v627_v40 }
 0x252   :  { %1653 = vrcp.f32 %v1173_v1  ;;  %v821_v45 = vpop.f32.mrf.mxu3  ;;  %v1176_v47 = vadd.f32 1.0, %v1648_v41  ;;  %v1650_v52 = vpop.eup %1649 }
 0x253   :  { %1324 = vst [vmem:[%s2522_s7 + $0x38] sm:$0xff] %v1292_v42  ;;  %1655 = vpow2.f32 %v1071_v44  ;;  %v822_v46 = vadd.f32 %v821_v45, %v2340_v50  ;;  %v665_v5 = vmax.f32 %v628_v38, 0.0 }
 0x254   :  { %v912_v49 = vpop.f32.mrf.mxu0  ;;  %1657 = vrcp.f32 %v1176_v47 }
 0x255   :  { %v985_v21 = vsub.f32 0.0, %v822_v46  ;;  %v913_v51 = vadd.f32 %v912_v49, %v2337_v43 }
 0x257   :  { %v1652_v54 = vpop.eup %1651  ;;  %v1069_v20 = vmul.f32 1.442695, %v985_v21  ;;  %v988_v55 = vsub.f32 0.0, %v913_v51 }
 0x258   :  { %v1654_v22 = vpop.eup %1653  ;;  %v1175_v56 = vadd.f32 1.0, %v1652_v54  ;;  %v629_v57 = vpop.f32.mrf.mxu2 }
 0x259   :  { %v1656_v58 = vpop.eup %1655  ;;  %v1293_v59 = vpack.c.bf16 %v1650_v52, %v1654_v22  ;;  %1659 = vpow2.f32 %v1069_v20  ;;  %v1075_v60 = vmul.f32 1.442695, %v988_v55  ;;  %v630_v61 = vadd.f32 %v2299_v48, %v629_v57 }
 0x25a   :  { %1661 = vrcp.f32 %v1175_v56  ;;  %v823_v0 = vpop.f32.mrf.mxu3  ;;  %v1178_v2 = vadd.f32 1.0, %v1656_v58  ;;  %v1658_v7 = vpop.eup %1657 }
 0x25b   :  { %1325 = vst [vmem:[%s2522_s7 + $0x40] sm:$0xff] %v1293_v59  ;;  %1663 = vpow2.f32 %v1075_v60  ;;  %v666_v62 = vmax.f32 %v630_v61, 0.0  ;;  %v824_v63 = vadd.f32 %v823_v0, %v2340_v50 }
 0x25c   :  { %v915_v3 = vpop.f32.mrf.mxu0  ;;  %1665 = vrcp.f32 %v1178_v2 }
 0x25d   :  { %v683_v53 = vpack.c.bf16 %v666_v62, %v665_v5  ;;  %v987_v4 = vsub.f32 0.0, %v824_v63  ;;  %v916_v6 = vadd.f32 %v915_v3, %v2337_v43 }
 0x25f   :  { %v1660_v8 = vpop.eup %1659  ;;  %v1073_v9 = vmul.f32 1.442695, %v987_v4  ;;  %v990_v11 = vsub.f32 0.0, %v916_v6  ;;  %865 = vmatmul.bf16.gmra.mxu3 %v683_v53  ;;  %954 = vmatmul.bf16.gmra.mxu0 %v683_v53 }
 0x260   :  { %v1662_v12 = vpop.eup %1661  ;;  %v1177_v13 = vadd.f32 1.0, %v1660_v8  ;;  %v632_v27 = vpop.f32.mrf.mxu2 }
 0x261   :  { %v1664_v14 = vpop.eup %1663  ;;  %v1294_v16 = vpack.c.bf16 %v1658_v7, %v1662_v12  ;;  %1667 = vpow2.f32 %v1073_v9  ;;  %v1079_v17 = vmul.f32 1.442695, %v990_v11  ;;  %v633_v15 = vadd.f32 %v2299_v48, %v632_v27 }
 0x262   :  { %1669 = vrcp.f32 %v1177_v13  ;;  %v826_v18 = vpop.f32.mrf.mxu3  ;;  %v1180_v19 = vadd.f32 1.0, %v1664_v14  ;;  %v1666_v26 = vpop.eup %1665 }
 0x263   :  { %1326 = vst [vmem:[%s2522_s7 + $0x48] sm:$0xff] %v1294_v16  ;;  %1671 = vpow2.f32 %v1079_v17  ;;  %v827_v28 = vadd.f32 %v826_v18, %v2340_v50  ;;  %v667_v1 = vmax.f32 %v633_v15, 0.0 }
 0x264   :  { %v917_v23 = vpop.f32.mrf.mxu0  ;;  %1673 = vrcp.f32 %v1180_v19 }
 0x265   :  { %v989_v24 = vsub.f32 0.0, %v827_v28  ;;  %v918_v25 = vadd.f32 %v917_v23, %v2337_v43 }
 0x267   :  { %v1668_v10 = vpop.eup %1667  ;;  %v1077_v29 = vmul.f32 1.442695, %v989_v24  ;;  %v992_v30 = vsub.f32 0.0, %v918_v25 }
 0x268   :  { %v1670_v31 = vpop.eup %1669  ;;  %v1179_v34 = vadd.f32 1.0, %v1668_v10  ;;  %v634_v32 = vpop.f32.mrf.mxu2 }
 0x269   :  { %v1672_v33 = vpop.eup %1671  ;;  %v1295_v35 = vpack.c.bf16 %v1666_v26, %v1670_v31  ;;  %1675 = vpow2.f32 %v1077_v29  ;;  %v1083_v36 = vmul.f32 1.442695, %v992_v30  ;;  %v635_v37 = vadd.f32 %v2299_v48, %v634_v32 }
 0x26a   :  { %1677 = vrcp.f32 %v1179_v34  ;;  %v828_v39 = vpop.f32.mrf.mxu3  ;;  %v1182_v42 = vadd.f32 1.0, %v1672_v33  ;;  %v1674_v49 = vpop.eup %1673 }
 0x26b   :  { %1327 = vst [vmem:[%s2522_s7 + $0x50] sm:$0xff] %v1295_v35  ;;  %1679 = vpow2.f32 %v1083_v36  ;;  %v668_v40 = vmax.f32 %v635_v37, 0.0  ;;  %v829_v41 = vadd.f32 %v828_v39, %v2340_v50 }
 0x26c   :  { %v920_v44 = vpop.f32.mrf.mxu0  ;;  %1681 = vrcp.f32 %v1182_v42 }
 0x26d   :  { %v684_v45 = vpack.c.bf16 %v668_v40, %v667_v1  ;;  %v991_v46 = vsub.f32 0.0, %v829_v41  ;;  %v921_v47 = vadd.f32 %v920_v44, %v2337_v43 }
 0x26f   :  { %v1676_v21 = vpop.eup %1675  ;;  %v1081_v48 = vmul.f32 1.442695, %v991_v46  ;;  %v994_v51 = vsub.f32 0.0, %v921_v47  ;;  %870 = vmatmul.bf16.gmra.mxu3 %v684_v45  ;;  %959 = vmatmul.bf16.gmra.mxu0 %v684_v45 }
 0x270   :  { %v1678_v52 = vpop.eup %1677  ;;  %v1181_v54 = vadd.f32 1.0, %v1676_v21 }
 0x271   :  { %v1680_v38 = vpop.eup %1679  ;;  %v1296_v20 = vpack.c.bf16 %v1674_v49, %v1678_v52  ;;  %1683 = vpow2.f32 %v1081_v48  ;;  %v1087_v55 = vmul.f32 1.442695, %v994_v51 }
 0x272   :  { %1685 = vrcp.f32 %v1181_v54  ;;  %v831_v22 = vpop.f32.mrf.mxu3  ;;  %v1184_v57 = vadd.f32 1.0, %v1680_v38  ;;  %v1682_v61 = vpop.eup %1681 }
 0x273   :  { %1328 = vst [vmem:[%s2522_s7 + $0x58] sm:$0xff] %v1296_v20  ;;  %1687 = vpow2.f32 %v1087_v55  ;;  %v832_v56 = vadd.f32 %v831_v22, %v2340_v50 }
 0x274   :  { %v922_v58 = vpop.f32.mrf.mxu0  ;;  %1689 = vrcp.f32 %v1184_v57 }
 0x275   :  { %v993_v59 = vsub.f32 0.0, %v832_v56  ;;  %v923_v60 = vadd.f32 %v922_v58, %v2337_v43 }
 0x277   :  { %v1684_v0 = vpop.eup %1683  ;;  %v1085_v5 = vmul.f32 1.442695, %v993_v59  ;;  %v996_v62 = vsub.f32 0.0, %v923_v60 }
 0x278   :  { %v1686_v63 = vpop.eup %1685  ;;  %v1183_v2 = vadd.f32 1.0, %v1684_v0 }
 0x279   :  { %v1688_v3 = vpop.eup %1687  ;;  %v1297_v53 = vpack.c.bf16 %v1682_v61, %v1686_v63  ;;  %1691 = vpow2.f32 %v1085_v5  ;;  %v1091_v4 = vmul.f32 1.442695, %v996_v62 }
 0x27a   :  { %1693 = vrcp.f32 %v1183_v2  ;;  %v833_v6 = vpop.f32.mrf.mxu3  ;;  %v1186_v8 = vadd.f32 1.0, %v1688_v3  ;;  %v1690_v13 = vpop.eup %1689 }
 0x27b   :  { %1329 = vst [vmem:[%s2522_s7 + $0x60] sm:$0xff] %v1297_v53  ;;  %1695 = vpow2.f32 %v1091_v4  ;;  %v834_v7 = vadd.f32 %v833_v6, %v2340_v50 }
 0x27c   :  { %v925_v9 = vpop.f32.mrf.mxu0  ;;  %1697 = vrcp.f32 %v1186_v8 }
 0x27d   :  { %v995_v11 = vsub.f32 0.0, %v834_v7  ;;  %v926_v12 = vadd.f32 %v925_v9, %v2337_v43 }
 0x27f   :  { %v1692_v27 = vpop.eup %1691  ;;  %v1089_v14 = vmul.f32 1.442695, %v995_v11  ;;  %v998_v16 = vsub.f32 0.0, %v926_v12 }
 0x280   :  { %v1694_v17 = vpop.eup %1693  ;;  %v1185_v18 = vadd.f32 1.0, %v1692_v27 }
 0x281   :  { %v1696_v28 = vpop.eup %1695  ;;  %v1298_v19 = vpack.c.bf16 %v1690_v13, %v1694_v17  ;;  %1699 = vpow2.f32 %v1089_v14  ;;  %v1095_v23 = vmul.f32 1.442695, %v998_v16 }
 0x282   :  { %1701 = vrcp.f32 %v1185_v18  ;;  %v836_v24 = vpop.f32.mrf.mxu3  ;;  %v1188_v26 = vadd.f32 1.0, %v1696_v28  ;;  %v1698_v30 = vpop.eup %1697 }
 0x283   :  { %1330 = vst [vmem:[%s2522_s7 + $0x68] sm:$0xff] %v1298_v19  ;;  %1703 = vpow2.f32 %v1095_v23  ;;  %v837_v25 = vadd.f32 %v836_v24, %v2340_v50 }
 0x284   :  { %v927_v10 = vpop.f32.mrf.mxu0  ;;  %1705 = vrcp.f32 %v1188_v26 }
 0x285   :  { %v997_v15 = vsub.f32 0.0, %v837_v25  ;;  %v928_v29 = vadd.f32 %v927_v10, %v2337_v43 }
 0x287   :  { %v1700_v31 = vpop.eup %1699  ;;  %v1093_v34 = vmul.f32 1.442695, %v997_v15  ;;  %v1000_v32 = vsub.f32 0.0, %v928_v29 }
 0x288   :  { %v1702_v33 = vpop.eup %1701  ;;  %v1187_v35 = vadd.f32 1.0, %v1700_v31 }
 0x289   :  { %v1704_v36 = vpop.eup %1703  ;;  %v1299_v37 = vpack.c.bf16 %v1698_v30, %v1702_v33  ;;  %1707 = vpow2.f32 %v1093_v34  ;;  %v1099_v39 = vmul.f32 1.442695, %v1000_v32 }
 0x28a   :  { %1709 = vrcp.f32 %v1187_v35  ;;  %v838_v1 = vpop.f32.mrf.mxu3  ;;  %v1190_v41 = vadd.f32 1.0, %v1704_v36  ;;  %v1706_v46 = vpop.eup %1705 }
 0x28b   :  { %1331 = vst [vmem:[%s2522_s7 + $0x70] sm:$0xff] %v1299_v37  ;;  %1711 = vpow2.f32 %v1099_v39  ;;  %v839_v40 = vadd.f32 %v838_v1, %v2340_v50 }
 0x28c   :  { %v930_v42 = vpop.f32.mrf.mxu0  ;;  %1713 = vrcp.f32 %v1190_v41 }
 0x28d   :  { %v999_v44 = vsub.f32 0.0, %v839_v40  ;;  %v931_v45 = vadd.f32 %v930_v42, %v2337_v43 }
 0x28f   :  { %v1708_v47 = vpop.eup %1707  ;;  %v1097_v49 = vmul.f32 1.442695, %v999_v44  ;;  %v1002_v21 = vsub.f32 0.0, %v931_v45 }
 0x290   :  { %v1710_v48 = vpop.eup %1709  ;;  %v1189_v51 = vadd.f32 1.0, %v1708_v47 }
 0x291   :  { %v1712_v52 = vpop.eup %1711  ;;  %v1300_v54 = vpack.c.bf16 %v1706_v46, %v1710_v48  ;;  %1715 = vpow2.f32 %v1097_v49  ;;  %v1103_v38 = vmul.f32 1.442695, %v1002_v21 }
 0x292   :  { %1717 = vrcp.f32 %v1189_v51  ;;  %v841_v20 = vpop.f32.mrf.mxu3  ;;  %v1192_v22 = vadd.f32 1.0, %v1712_v52  ;;  %v1714_v59 = vpop.eup %1713 }
 0x293   :  { %1332 = vst [vmem:[%s2522_s7 + $0x78] sm:$0xff] %v1300_v54  ;;  %1719 = vpow2.f32 %v1103_v38  ;;  %v842_v55 = vadd.f32 %v841_v20, %v2340_v50 }
 0x294   :  { %v932_v56 = vpop.f32.mrf.mxu0  ;;  %1721 = vrcp.f32 %v1192_v22 }
 0x295   :  { %v1001_v57 = vsub.f32 0.0, %v842_v55  ;;  %v933_v58 = vadd.f32 %v932_v56, %v2337_v43 }
 0x297   :  { %v1716_v60 = vpop.eup %1715  ;;  %v1101_v61 = vmul.f32 1.442695, %v1001_v57  ;;  %v1004_v0 = vsub.f32 0.0, %v933_v58 }
 0x298   :  { %v1718_v5 = vpop.eup %1717  ;;  %v1191_v62 = vadd.f32 1.0, %v1716_v60 }
 0x299   :  { %v1720_v63 = vpop.eup %1719  ;;  %v1301_v2 = vpack.c.bf16 %v1714_v59, %v1718_v5  ;;  %1723 = vpow2.f32 %v1101_v61  ;;  %v1107_v3 = vmul.f32 1.442695, %v1004_v0 }
 0x29a   :  { %1725 = vrcp.f32 %v1191_v62  ;;  %v843_v53 = vpop.f32.mrf.mxu3  ;;  %v1194_v6 = vadd.f32 1.0, %v1720_v63  ;;  %v1722_v11 = vpop.eup %1721 }
 0x29b   :  { %1333 = vst [vmem:[%s2522_s7 + $0x80] sm:$0xff] %v1301_v2  ;;  %1727 = vpow2.f32 %v1107_v3  ;;  %v844_v4 = vadd.f32 %v843_v53, %v2340_v50 }
 0x29c   :  { %v935_v7 = vpop.f32.mrf.mxu0  ;;  %1729 = vrcp.f32 %v1194_v6 }
 0x29d   :  { %v1003_v8 = vsub.f32 0.0, %v844_v4  ;;  %v936_v9 = vadd.f32 %v935_v7, %v2337_v43 }
 0x29f   :  { %v1724_v12 = vpop.eup %1723  ;;  %v1105_v13 = vmul.f32 1.442695, %v1003_v8  ;;  %v1006_v27 = vsub.f32 0.0, %v936_v9 }
 0x2a0   :  { %v1726_v14 = vpop.eup %1725  ;;  %v1193_v16 = vadd.f32 1.0, %v1724_v12 }
 0x2a1   :  { %v1728_v17 = vpop.eup %1727  ;;  %v1302_v18 = vpack.c.bf16 %v1722_v11, %v1726_v14  ;;  %1731 = vpow2.f32 %v1105_v13  ;;  %v1111_v28 = vmul.f32 1.442695, %v1006_v27 }
 0x2a2   :  { %1733 = vrcp.f32 %v1193_v16  ;;  %v846_v19 = vpop.f32.mrf.mxu3  ;;  %v1196_v24 = vadd.f32 1.0, %v1728_v17  ;;  %v1730_v15 = vpop.eup %1729 }
 0x2a3   :  { %1334 = vst [vmem:[%s2522_s7 + $0x88] sm:$0xff] %v1302_v18  ;;  %1735 = vpow2.f32 %v1111_v28  ;;  %v847_v23 = vadd.f32 %v846_v19, %v2340_v50 }
 0x2a4   :  { %v937_v25 = vpop.f32.mrf.mxu0  ;;  %1737 = vrcp.f32 %v1196_v24 }
 0x2a5   :  { %v1005_v26 = vsub.f32 0.0, %v847_v23  ;;  %v938_v10 = vadd.f32 %v937_v25, %v2337_v43 }
 0x2a7   :  { %v1732_v29 = vpop.eup %1731  ;;  %v1109_v30 = vmul.f32 1.442695, %v1005_v26  ;;  %v1008_v31 = vsub.f32 0.0, %v938_v10 }
 0x2a8   :  { %v1734_v34 = vpop.eup %1733  ;;  %v1195_v32 = vadd.f32 1.0, %v1732_v29 }
 0x2a9   :  { %v1736_v33 = vpop.eup %1735  ;;  %v1303_v35 = vpack.c.bf16 %v1730_v15, %v1734_v34  ;;  %1739 = vpow2.f32 %v1109_v30  ;;  %v1115_v36 = vmul.f32 1.442695, %v1008_v31 }
 0x2aa   :  { %1741 = vrcp.f32 %v1195_v32  ;;  %v848_v37 = vpop.f32.mrf.mxu3  ;;  %v1198_v1 = vadd.f32 1.0, %v1736_v33  ;;  %v1738_v44 = vpop.eup %1737 }
 0x2ab   :  { %1335 = vst [vmem:[%s2522_s7 + $0x90] sm:$0xff] %v1303_v35  ;;  %1743 = vpow2.f32 %v1115_v36  ;;  %v849_v39 = vadd.f32 %v848_v37, %v2340_v50 }
 0x2ac   :  { %v940_v40 = vpop.f32.mrf.mxu0  ;;  %1745 = vrcp.f32 %v1198_v1 }
 0x2ad   :  { %v1007_v41 = vsub.f32 0.0, %v849_v39  ;;  %v941_v42 = vadd.f32 %v940_v40, %v2337_v43 }
 0x2af   :  { %v1740_v45 = vpop.eup %1739  ;;  %v1113_v46 = vmul.f32 1.442695, %v1007_v41  ;;  %v1010_v47 = vsub.f32 0.0, %v941_v42 }
 0x2b0   :  { %v1742_v49 = vpop.eup %1741  ;;  %v1197_v21 = vadd.f32 1.0, %v1740_v45 }
 0x2b1   :  { %v1744_v48 = vpop.eup %1743  ;;  %v1304_v51 = vpack.c.bf16 %v1738_v44, %v1742_v49  ;;  %1747 = vpow2.f32 %v1113_v46  ;;  %v1119_v52 = vmul.f32 1.442695, %v1010_v47 }
 0x2b2   :  { %1749 = vrcp.f32 %v1197_v21  ;;  %v851_v54 = vpop.f32.mrf.mxu3  ;;  %v1200_v20 = vadd.f32 1.0, %v1744_v48  ;;  %v1746_v57 = vpop.eup %1745 }
 0x2b3   :  { %1336 = vst [vmem:[%s2522_s7 + $0x98] sm:$0xff] %v1304_v51  ;;  %1751 = vpow2.f32 %v1119_v52  ;;  %v852_v38 = vadd.f32 %v851_v54, %v2340_v50 }
 0x2b4   :  { %v942_v55 = vpop.f32.mrf.mxu0  ;;  %1753 = vrcp.f32 %v1200_v20 }
 0x2b5   :  { %v1009_v22 = vsub.f32 0.0, %v852_v38  ;;  %v943_v56 = vadd.f32 %v942_v55, %v2337_v43 }
 0x2b7   :  { %v1748_v58 = vpop.eup %1747  ;;  %v1117_v59 = vmul.f32 1.442695, %v1009_v22  ;;  %v1012_v60 = vsub.f32 0.0, %v943_v56 }
 0x2b8   :  { %v1750_v61 = vpop.eup %1749  ;;  %v1199_v0 = vadd.f32 1.0, %v1748_v58 }
 0x2b9   :  { %v1752_v5 = vpop.eup %1751  ;;  %v1305_v62 = vpack.c.bf16 %v1746_v57, %v1750_v61  ;;  %1755 = vpow2.f32 %v1117_v59  ;;  %v1123_v63 = vmul.f32 1.442695, %v1012_v60 }
 0x2ba   :  { %1757 = vrcp.f32 %v1199_v0  ;;  %v853_v2 = vpop.f32.mrf.mxu3  ;;  %v1202_v53 = vadd.f32 1.0, %v1752_v5  ;;  %v1754_v8 = vpop.eup %1753 }
 0x2bb   :  { %1337 = vst [vmem:[%s2522_s7 + $0xa0] sm:$0xff] %v1305_v62  ;;  %1759 = vpow2.f32 %v1123_v63  ;;  %v854_v3 = vadd.f32 %v853_v2, %v2340_v50 }
 0x2bc   :  { %v945_v4 = vpop.f32.mrf.mxu0  ;;  %1761 = vrcp.f32 %v1202_v53 }
 0x2bd   :  { %v1011_v6 = vsub.f32 0.0, %v854_v3  ;;  %v946_v7 = vadd.f32 %v945_v4, %v2337_v43 }
 0x2bf   :  { %v1756_v9 = vpop.eup %1755  ;;  %v1121_v11 = vmul.f32 1.442695, %v1011_v6  ;;  %v1014_v12 = vsub.f32 0.0, %v946_v7 }
 0x2c0   :  { %v1758_v13 = vpop.eup %1757  ;;  %v1201_v27 = vadd.f32 1.0, %v1756_v9 }
 0x2c1   :  { %v1760_v14 = vpop.eup %1759  ;;  %v1306_v16 = vpack.c.bf16 %v1754_v8, %v1758_v13  ;;  %1763 = vpow2.f32 %v1121_v11  ;;  %v1127_v17 = vmul.f32 1.442695, %v1014_v12 }
 0x2c2   :  { %1765 = vrcp.f32 %v1201_v27  ;;  %v856_v18 = vpop.f32.mrf.mxu3  ;;  %v1204_v19 = vadd.f32 1.0, %v1760_v14  ;;  %v1762_v26 = vpop.eup %1761 }
 0x2c3   :  { %1338 = vst [vmem:[%s2522_s7 + $0xa8] sm:$0xff] %v1306_v16  ;;  %1767 = vpow2.f32 %v1127_v17  ;;  %v857_v28 = vadd.f32 %v856_v18, %v2340_v50 }
 0x2c4   :  { %v947_v23 = vpop.f32.mrf.mxu0  ;;  %1769 = vrcp.f32 %v1204_v19 }
 0x2c5   :  { %v1013_v24 = vsub.f32 0.0, %v857_v28  ;;  %v948_v25 = vadd.f32 %v947_v23, %v2337_v43 }
 0x2c7   :  { %v1764_v10 = vpop.eup %1763  ;;  %v1125_v15 = vmul.f32 1.442695, %v1013_v24  ;;  %v1016_v29 = vsub.f32 0.0, %v948_v25 }
 0x2c8   :  { %v1766_v30 = vpop.eup %1765  ;;  %v1203_v31 = vadd.f32 1.0, %v1764_v10 }
 0x2c9   :  { %v1768_v34 = vpop.eup %1767  ;;  %v1307_v32 = vpack.c.bf16 %v1762_v26, %v1766_v30  ;;  %1771 = vpow2.f32 %v1125_v15  ;;  %v1131_v33 = vmul.f32 1.442695, %v1016_v29 }
 0x2ca   :  { %1773 = vrcp.f32 %v1203_v31  ;;  %v858_v35 = vpop.f32.mrf.mxu3  ;;  %v1206_v37 = vadd.f32 1.0, %v1768_v34  ;;  %v1770_v41 = vpop.eup %1769 }
 0x2cb   :  { %1339 = vst [vmem:[%s2522_s7 + $0xb0] sm:$0xff] %v1307_v32  ;;  %1775 = vpow2.f32 %v1131_v33  ;;  %v859_v36 = vadd.f32 %v858_v35, %v2340_v50 }
 0x2cc   :  { %v950_v39 = vpop.f32.mrf.mxu0  ;;  %1777 = vrcp.f32 %v1206_v37 }
 0x2cd   :  { %v1015_v1 = vsub.f32 0.0, %v859_v36  ;;  %v951_v40 = vadd.f32 %v950_v39, %v2337_v43 }
 0x2cf   :  { %v1772_v42 = vpop.eup %1771  ;;  %v1129_v44 = vmul.f32 1.442695, %v1015_v1  ;;  %v1018_v45 = vsub.f32 0.0, %v951_v40 }
 0x2d0   :  { %v1774_v46 = vpop.eup %1773  ;;  %v1205_v47 = vadd.f32 1.0, %v1772_v42 }
 0x2d1   :  { %v1776_v49 = vpop.eup %1775  ;;  %v1308_v21 = vpack.c.bf16 %v1770_v41, %v1774_v46  ;;  %1779 = vpow2.f32 %v1129_v44  ;;  %v1135_v48 = vmul.f32 1.442695, %v1018_v45 }
 0x2d2   :  { %1781 = vrcp.f32 %v1205_v47  ;;  %v861_v51 = vpop.f32.mrf.mxu3  ;;  %v1208_v54 = vadd.f32 1.0, %v1776_v49  ;;  %v1778_v22 = vpop.eup %1777 }
 0x2d3   :  { %1340 = vst [vmem:[%s2522_s7 + $0xb8] sm:$0xff] %v1308_v21  ;;  %1783 = vpow2.f32 %v1135_v48  ;;  %v862_v52 = vadd.f32 %v861_v51, %v2340_v50 }
 0x2d4   :  { %v952_v38 = vpop.f32.mrf.mxu0  ;;  %1785 = vrcp.f32 %v1208_v54 }
 0x2d5   :  { %v1017_v20 = vsub.f32 0.0, %v862_v52  ;;  %v953_v55 = vadd.f32 %v952_v38, %v2337_v43 }
 0x2d7   :  { %v1780_v56 = vpop.eup %1779  ;;  %v1133_v57 = vmul.f32 1.442695, %v1017_v20  ;;  %v1020_v58 = vsub.f32 0.0, %v953_v55 }
 0x2d8   :  { %v1782_v59 = vpop.eup %1781  ;;  %v1207_v60 = vadd.f32 1.0, %v1780_v56 }
 0x2d9   :  { %v1784_v61 = vpop.eup %1783  ;;  %v1309_v0 = vpack.c.bf16 %v1778_v22, %v1782_v59  ;;  %1787 = vpow2.f32 %v1133_v57  ;;  %v1139_v5 = vmul.f32 1.442695, %v1020_v58 }
 0x2da   :  { %1789 = vrcp.f32 %v1207_v60  ;;  %v863_v62 = vpop.f32.mrf.mxu3  ;;  %v1210_v2 = vadd.f32 1.0, %v1784_v61  ;;  %v1786_v6 = vpop.eup %1785 }
 0x2db   :  { %1341 = vst [vmem:[%s2522_s7 + $0xc0] sm:$0xff] %v1309_v0  ;;  %1791 = vpow2.f32 %v1139_v5  ;;  %v864_v63 = vadd.f32 %v863_v62, %v2340_v50 }
 0x2dc   :  { %v955_v3 = vpop.f32.mrf.mxu0  ;;  %1793 = vrcp.f32 %v1210_v2 }
 0x2dd   :  { %v1019_v53 = vsub.f32 0.0, %v864_v63  ;;  %v956_v4 = vadd.f32 %v955_v3, %v2337_v43 }
 0x2df   :  { %v1788_v7 = vpop.eup %1787  ;;  %v1137_v8 = vmul.f32 1.442695, %v1019_v53  ;;  %v1022_v9 = vsub.f32 0.0, %v956_v4 }
 0x2e0   :  { %v1790_v11 = vpop.eup %1789  ;;  %v1209_v12 = vadd.f32 1.0, %v1788_v7 }
 0x2e1   :  { %v1792_v13 = vpop.eup %1791  ;;  %v1310_v27 = vpack.c.bf16 %v1786_v6, %v1790_v11  ;;  %1795 = vpow2.f32 %v1137_v8  ;;  %v1143_v14 = vmul.f32 1.442695, %v1022_v9 }
 0x2e2   :  { %1797 = vrcp.f32 %v1209_v12  ;;  %v866_v16 = vpop.f32.mrf.mxu3  ;;  %v1212_v18 = vadd.f32 1.0, %v1792_v13  ;;  %v1794_v24 = vpop.eup %1793 }
 0x2e3   :  { %1342 = vst [vmem:[%s2522_s7 + $0xc8] sm:$0xff] %v1310_v27  ;;  %1799 = vpow2.f32 %v1143_v14  ;;  %v867_v17 = vadd.f32 %v866_v16, %v2340_v50 }
 0x2e4   :  { %v957_v28 = vpop.f32.mrf.mxu0  ;;  %1801 = vrcp.f32 %v1212_v18 }
 0x2e5   :  { %v1021_v19 = vsub.f32 0.0, %v867_v17  ;;  %v958_v23 = vadd.f32 %v957_v28, %v2337_v43 }
 0x2e7   :  { %v1796_v25 = vpop.eup %1795  ;;  %v1141_v26 = vmul.f32 1.442695, %v1021_v19  ;;  %v1024_v10 = vsub.f32 0.0, %v958_v23 }
 0x2e8   :  { %v1798_v15 = vpop.eup %1797  ;;  %v1211_v29 = vadd.f32 1.0, %v1796_v25 }
 0x2e9   :  { %v1800_v30 = vpop.eup %1799  ;;  %v1311_v31 = vpack.c.bf16 %v1794_v24, %v1798_v15  ;;  %1803 = vpow2.f32 %v1141_v26  ;;  %v1147_v34 = vmul.f32 1.442695, %v1024_v10 }
 0x2ea   :  { %1805 = vrcp.f32 %v1211_v29  ;;  %v868_v32 = vpop.f32.mrf.mxu3  ;;  %v1214_v35 = vadd.f32 1.0, %v1800_v30  ;;  %v1802_v1 = vpop.eup %1801 }
 0x2eb   :  { %1343 = vst [vmem:[%s2522_s7 + $0xd0] sm:$0xff] %v1311_v31  ;;  %1807 = vpow2.f32 %v1147_v34  ;;  %v869_v33 = vadd.f32 %v868_v32, %v2340_v50 }
 0x2ec   :  { %v960_v36 = vpop.f32.mrf.mxu0  ;;  %1809 = vrcp.f32 %v1214_v35 }
 0x2ed   :  { %v1023_v37 = vsub.f32 0.0, %v869_v33  ;;  %v961_v39 = vadd.f32 %v960_v36, %v2337_v43 }
 0x2ef   :  { %v1804_v40 = vpop.eup %1803  ;;  %v1145_v41 = vmul.f32 1.442695, %v1023_v37  ;;  %v1026_v42 = vsub.f32 0.0, %v961_v39 }
 0x2f0   :  { %v1806_v44 = vpop.eup %1805  ;;  %v1213_v45 = vadd.f32 1.0, %v1804_v40 }
 0x2f1   :  { %v1808_v46 = vpop.eup %1807  ;;  %v1312_v47 = vpack.c.bf16 %v1802_v1, %v1806_v44  ;;  %1811 = vpow2.f32 %v1145_v41  ;;  %v1151_v49 = vmul.f32 1.442695, %v1026_v42 }
 0x2f2   :  { %1813 = vrcp.f32 %v1213_v45  ;;  %v871_v21 = vpop.f32.mrf.mxu3  ;;  %v1216_v51 = vadd.f32 1.0, %v1808_v46  ;;  %v1810_v20 = vpop.eup %1809 }
 0x2f3   :  { %1344 = vst [vmem:[%s2522_s7 + $0xd8] sm:$0xff] %v1312_v47  ;;  %1815 = vpow2.f32 %v1151_v49  ;;  %v872_v48 = vadd.f32 %v871_v21, %v2340_v50 }
 0x2f4   :  { %v962_v52 = vpop.f32.mrf.mxu0  ;;  %1817 = vrcp.f32 %v1216_v51 }
 0x2f5   :  { %v1025_v54 = vsub.f32 0.0, %v872_v48  ;;  %v963_v38 = vadd.f32 %v962_v52, %v2337_v43 }
 0x2f7   :  { %v1812_v55 = vpop.eup %1811  ;;  %v1149_v22 = vmul.f32 1.442695, %v1025_v54  ;;  %v1028_v56 = vsub.f32 0.0, %v963_v38 }
 0x2f8   :  { %v1814_v57 = vpop.eup %1813  ;;  %v1215_v58 = vadd.f32 1.0, %v1812_v55 }
 0x2f9   :  { %v1816_v59 = vpop.eup %1815  ;;  %v1313_v60 = vpack.c.bf16 %v1810_v20, %v1814_v57  ;;  %1819 = vpow2.f32 %v1149_v22  ;;  %v1155_v61 = vmul.f32 1.442695, %v1028_v56 }
 0x2fa   :  { %1821 = vrcp.f32 %v1215_v58  ;;  %v873_v0 = vpop.f32.mrf.mxu3  ;;  %v1218_v43 = vadd.f32 1.0, %v1816_v59  ;;  %v1818_v63 = vpop.eup %1817 }
 0x2fb   :  { %1345 = vst [vmem:[%s2522_s7 + $0xe0] sm:$0xff] %v1313_v60  ;;  %v874_v5 = vadd.f32 %v873_v0, %v2340_v50  ;;  %1823 = vpow2.f32 %v1155_v61 }
 0x2fc   :  { %1825 = vrcp.f32 %v1218_v43 }
 0x2fd   :  { %v1027_v62 = vsub.f32 0.0, %v874_v5 }
 0x2ff   :  { %v1820_v2 = vpop.eup %1819  ;;  %v1153_v3 = vmul.f32 1.442695, %v1027_v62 }
 0x300   :  { %v1822_v53 = vpop.eup %1821  ;;  %v1217_v4 = vadd.f32 1.0, %v1820_v2 }
 0x301   :  { %v1314_v6 = vpack.c.bf16 %v1818_v63, %v1822_v53  ;;  %1827 = vpow2.f32 %v1153_v3  ;;  %v1824_v7 = vpop.eup %1823 }
 0x302   :  { %1829 = vrcp.f32 %v1217_v4  ;;  %v1220_v8 = vadd.f32 1.0, %v1824_v7  ;;  %v1826_v9 = vpop.eup %1825 }
 0x303   :  { %1346 = vst [vmem:[%s2522_s7 + $0xe8] sm:$0xff] %v1314_v6 }
 0x304   :  { %1831 = vrcp.f32 %v1220_v8 }
 0x307   :  { %v1828_v50 = vpop.eup %1827 }
 0x308   :  { %v1830_v11 = vpop.eup %1829  ;;  %v1219_v12 = vadd.f32 1.0, %v1828_v50 }
 0x309   :  { %v1315_v13 = vpack.c.bf16 %v1826_v9, %v1830_v11 }
 0x30a   :  { %1833 = vrcp.f32 %v1219_v12  ;;  %v1832_v27 = vpop.eup %1831 }
 0x30b   :  { %1347 = vst [vmem:[%s2522_s7 + $0xf0] sm:$0xff] %v1315_v13 }
 0x310   :  { %v1834_v14 = vpop.eup %1833 }
 0x311   :  { %v1316_v16 = vpack.c.bf16 %v1832_v27, %v1834_v14 }
 0x313   :  { %1348 = vst [vmem:[%s2522_s7 + $0xf8] sm:$0xff] %v1316_v16 }

</bundles_post_ra>
